<compile_context>
chip_gen: v5e
topology: v5e:2x2
jax: 0.10.0
libtpu: 0.0.40
codegen_flags: <defaults>
</compile_context>

<pallas_src>
import functools

import jax
import jax.numpy as jnp
from jax.experimental import pallas as pl
from jax.experimental.pallas import tpu as pltpu

VMEM_SPEC = pl.BlockSpec(memory_space=pltpu.MemorySpace.VMEM)
HEADS = 3


# ----------------------------------------------------------------------------
# Pallas kernels
# ----------------------------------------------------------------------------
def _edge_prep_kernel(e_ref, eeWT_ref, eeb_ref, vT_ref, o_ref):
    """per-edge attention terms for all 3 layers x 3 heads.

    e_ref  : [E, edge_dim]
    eeWT_ref: [edge_dim, e_exp]   expand_edge_dim weight (transposed)
    eeb_ref: [1, e_exp]
    vT_ref : [e_exp, 3*H]         folded  (lin_edge_w, att_edge)  per layer/head
    o_ref  : [E, 3*H]             alpha_edge contribution per edge
    """
    ea = jnp.maximum(
        jnp.dot(e_ref[...], eeWT_ref[...], preferred_element_type=jnp.float32)
        + eeb_ref[...], 0.0)                                        # relu(expand_edge_dim)
    o_ref[...] = jnp.dot(ea, vT_ref[...],
                         preferred_element_type=jnp.float32).astype(o_ref.dtype)


def _gat_forward_kernel(
    xf_ref, mult_ref, adj_ref, ae_ref,
    exp_wT_ref, exp_b_ref,
    w0_ref, as0_ref, ad0_ref, b0_ref,
    w1_ref, as1_ref, ad1_ref, b1_ref,
    w2_ref, as2_ref, ad2_ref, b2_ref,
    pool_ref, m1wT_ref, m1b_ref, m2wT_ref, m2b_ref,
    o_ref, *, heads, out_chs):
    """Fully fused forward.

    xf_ref  : [N, node_dim]        node features (without multipli column)
    mult_ref: [N, 1]
    adj_ref : [N, N]               adjacency mask incl. self loops (dst, src)
    ae_ref  : [3*H, N, N]          precomputed edge-attention contribution per layer/head
    exp_*   : node expand linear
    w{l}    : [Cin, H*C]           GAT lin weight (transposed)
    as{l}   : [H, H*C]             block-diagonal att_src
    ad{l}   : [H*C, H]             block-diagonal att_dst
    b{l}    : [1, C]               GAT bias
    pool_ref: [G, N]               one-hot batch assignment (global_add_pool)
    m1/m2   : MLP linears
    o_ref   : [G, out_dim]
    """
    neg_inf = jnp.float32(-1e30)
    adj_mask = adj_ref[...] > 0

    # expand_dim + relu
    h = jnp.maximum(
        jnp.dot(xf_ref[...], exp_wT_ref[...], preferred_element_type=jnp.float32)
        + exp_b_ref[...], 0.0)

    layers = ((w0_ref, as0_ref, ad0_ref, b0_ref, out_chs[0]),
              (w1_ref, as1_ref, ad1_ref, b1_ref, out_chs[1]),
              (w2_ref, as2_ref, ad2_ref, b2_ref, out_chs[2]))

    for layer, (w_ref, asb_ref, adb_ref, bias_ref, c_out) in enumerate(layers):
        wx = jnp.dot(h, w_ref[...], preferred_element_type=jnp.float32)     # [N, H*C]

        # batched attention scores: one MXU push per side instead of 2*H tiny ones
        a_srcT = jax.lax.dot_general(asb_ref[...], wx, (((1,), (1,)), ((), ())),
                                     preferred_element_type=jnp.float32)    # [H, N]
        a_dst = jnp.dot(wx, adb_ref[...], preferred_element_type=jnp.float32)  # [N, H]

        acc = None
        for hh in range(heads):
            s = a_dst[:, hh:hh + 1] + a_srcT[hh:hh + 1, :] + ae_ref[layer * heads + hh]
            s = jnp.where(s > 0, s, 0.2 * s)                 # leaky_relu(0.2)
            s = jnp.where(adj_mask, s, neg_inf)              # edge mask (self loops present)
            m = jnp.max(s, axis=-1, keepdims=True)
            p = jnp.exp(s - m)
            alpha = p * pl.reciprocal(jnp.sum(p, axis=-1, keepdims=True), approx=True)
            out_h = jnp.dot(alpha, wx[:, hh * c_out:(hh + 1) * c_out],
                            preferred_element_type=jnp.float32)             # [N, C]
            acc = out_h if acc is None else acc + out_h

        # concat=False -> head mean + bias, then F.relu
        h = jnp.maximum(acc * jnp.float32(1.0 / heads) + bias_ref[...], 0.0)

    # x * multipli -> global_add_pool -> MLP (relu, relu)
    xm = h * mult_ref[...]
    pooled = jnp.dot(pool_ref[...], xm, preferred_element_type=jnp.float32)  # [G, C]
    z = jnp.maximum(
        jnp.dot(pooled, m1wT_ref[...], preferred_element_type=jnp.float32) + m1b_ref[...],
        0.0)
    out = jnp.maximum(
        jnp.dot(z, m2wT_ref[...], preferred_element_type=jnp.float32) + m2b_ref[...],
        0.0)
    o_ref[...] = out.astype(o_ref.dtype)


# ----------------------------------------------------------------------------
# Wrappers
# ----------------------------------------------------------------------------
def edge_prep(edge_attr, ee_w, ee_b, vT):
    out_shape = jax.ShapeDtypeStruct((edge_attr.shape[0], vT.shape[1]), jnp.float32)
    return pl.pallas_call(
        _edge_prep_kernel,
        out_shape=out_shape,
        in_specs=[VMEM_SPEC] * 4,
        out_specs=VMEM_SPEC,
    )(edge_attr, ee_w.T, ee_b[None, :], vT)


def fused_gat_forward(xf, mult, adj, ae, params_flat, pool_mat, out_dim, out_chs):
    kern = functools.partial(_gat_forward_kernel, heads=HEADS, out_chs=tuple(out_chs))
    out_shape = jax.ShapeDtypeStruct((pool_mat.shape[0], out_dim), jnp.float32)
    args = (xf, mult, adj, ae) + tuple(params_flat[:2]) + tuple(params_flat[2:14]) \
           + (pool_mat,) + tuple(params_flat[14:])
    return pl.pallas_call(
        kern,
        out_shape=out_shape,
        in_specs=[VMEM_SPEC] * len(args),
        out_specs=VMEM_SPEC,
    )(*args)


def _blockdiag(att):
    """[H, C] -> [H, H*C] block-diagonal layout (row h has att[h] at cols h*C:(h+1)*C)."""
    H, C = att.shape
    eye = jnp.eye(H, dtype=att.dtype)
    return (eye[:, :, None] * att[:, None, :]).reshape(H, H * C)


# ----------------------------------------------------------------------------
# Parameter init (deterministic, synthetic)
# ----------------------------------------------------------------------------
def init_params(key, mp):
    heads = HEADS
    node_dim = mp['node_dim']
    n_exp = mp['node_expand_dim']
    e_dim = mp['edge_dim']
    e_exp = mp['edge_expand_dim']
    dims = mp['dimensionslist']

    def nrm(k, shape, scale=0.1):
        return jax.random.normal(k, shape, jnp.float32) * scale

    keys = iter(jax.random.split(key, 64))
    params = {
        'expand_w': nrm(next(keys), (n_exp, node_dim)),
        'expand_b': nrm(next(keys), (n_exp,)),
        'ee_w': nrm(next(keys), (e_exp, e_dim)),
        'ee_b': nrm(next(keys), (e_exp,)),
        'gat_layers': [],
    }
    c_in = n_exp
    for layer in range(3):
        c_out = dims[layer][1]
        params['gat_layers'].append({
            'lin_w': nrm(next(keys), (heads * c_out, c_in)),        # no bias (PyG lin)
            'lin_edge_w': nrm(next(keys), (heads * c_out, e_exp)),  # no bias
            'att_src': nrm(next(keys), (heads, c_out)),
            'att_dst': nrm(next(keys), (heads, c_out)),
            'att_edge': nrm(next(keys), (heads, c_out)),
            'bias': nrm(next(keys), (c_out,)),
        })
        c_in = c_out
    params['l1_w'] = nrm(next(keys), (mp['MLP1_dim'], c_in))
    params['l1_b'] = nrm(next(keys), (mp['MLP1_dim'],))
    params['l2_w'] = nrm(next(keys), (mp['MLP2_dim'], mp['MLP1_dim']))
    params['l2_b'] = nrm(next(keys), (mp['MLP2_dim'],))
    return params


# ----------------------------------------------------------------------------
# Forward pass (glue in JAX, hot path in 2 Pallas calls)
# ----------------------------------------------------------------------------
@functools.partial(jax.jit, static_argnames=('num_graphs',))
def gat_model_forward(params, x, edge_index, edge_attr, batch, *, num_graphs):
    heads = HEADS
    N = x.shape[0]
    e_exp = params['ee_w'].shape[0]

    multipli = x[:, -1:]            # [N, 1]
    xf = x[:, :-1]                  # [N, node_dim]

    # --- fold (lin_edge_w, att_edge) of all layers into one [e_exp, 3*H] projection ---
    v_rows = []
    out_chs = []
    for lp in params['gat_layers']:
        c_out = lp['bias'].shape[0]
        out_chs.append(c_out)
        we = lp['lin_edge_w'].reshape(heads, c_out, e_exp)
        v_rows.append(jnp.einsum('hc,hce->he', lp['att_edge'], we))   # [H, e_exp]
    vT = jnp.concatenate(v_rows, axis=0).T                            # [e_exp, 3*H]

    # per-edge attention terms (Pallas): relu(expand_edge_dim(e)) @ v  -> [E, 3*H]
    ae_e = edge_prep(edge_attr, params['ee_w'], params['ee_b'], vT)

    # --- dense (dst, src) adjacency & edge-attention scatter, incl. self loops with
    #     fill_value='mean' (PyG add_self_loops default inside GATConv) ---
    # TODO(synk): data-dependent edge_index scatter stays in plain JAX glue
    #             (no clean Pallas gather/scatter without scalar-prefetch CSR).
    src, dst = edge_index[0], edge_index[1]
    adj = jnp.zeros((N, N), jnp.float32).at[dst, src].set(1.0)
    ae_dense = jnp.zeros((N, N, 3 * heads), jnp.float32).at[dst, src].set(ae_e)
    deg = jnp.zeros((N,), jnp.float32).at[dst].add(1.0)
    sum_in = jnp.zeros((N, 3 * heads), jnp.float32).at[dst].add(ae_e)
    loop_ae = sum_in / jnp.maximum(deg, 1.0)[:, None]     # mean fill (linear => exact)
    idx = jnp.arange(N)
    ae_dense = ae_dense.at[idx, idx].set(loop_ae)
    adj = adj.at[idx, idx].set(1.0)
    ae = jnp.transpose(ae_dense, (2, 0, 1))               # [3*H, N, N] (dst, src)

    # --- pack per-layer params with batched block-diagonal attention matrices ---
    params_flat = [xf.dtype.type(0)] * 0  # placeholder list build below
    params_flat = [params['expand_w'].T, params['expand_b'][None, :]]
    for lp in params['gat_layers']:
        params_flat += [
            lp['lin_w'].T,                    # [Cin, H*C]
            _blockdiag(lp['att_src']),        # [H, H*C]
            _blockdiag(lp['att_dst']).T,      # [H*C, H]
            lp['bias'][None, :],              # [1, C]
        ]
    params_flat += [params['l1_w'].T, params['l1_b'][None, :],
                    params['l2_w'].T, params['l2_b'][None, :]]

    pool_mat = jax.nn.one_hot(batch, num_graphs, dtype=jnp.float32).T   # [G, N]

    return fused_gat_forward(xf, multipli, adj, ae, params_flat, pool_mat,
                             params['l2_w'].shape[0], out_chs)


# ----------------------------------------------------------------------------
if __name__ == "__main__":
    model_params = dict(
        node_dim=6,            # data.x has node_dim + 1 columns (last col = multipli)
        node_expand_dim=16,
        edge_dim=4,
        edge_expand_dim=8,
        MLP1_dim=32,
        MLP2_dim=4,
        dimensionslist=[[16, 16], [16, 16], [16, 8]],
    )

    key = jax.random.PRNGKey(0)
    k_param, k_x, k_e = jax.random.split(key, 3)
    params = init_params(k_param, model_params)

    # synthetic batch of 2 ring graphs, 8 nodes each
    n_per, num_graphs = 8, 2
    N = n_per * num_graphs
    srcs, dsts = [], []
    for g in range(num_graphs):
        base = g * n_per
        for i in range(n_per):
            j = (i + 1) % n_per
            srcs += [base + i, base + j]
            dsts += [base + j, base + i]
    edge_index = jnp.array([srcs, dsts], dtype=jnp.int32)   # [2, E]
    E = edge_index.shape[1]

    x = jax.random.normal(k_x, (N, model_params['node_dim'] + 1), jnp.float32)
    edge_attr = jax.random.normal(k_e, (E, model_params['edge_dim']), jnp.float32)
    batch = jnp.array([0] * n_per + [1] * n_per, dtype=jnp.int32)

    out = gat_model_forward(params, x, edge_index, edge_attr, batch,
                            num_graphs=num_graphs)
    out = jax.block_until_ready(out)
    assert out.shape == (num_graphs, model_params['MLP2_dim'])
    print("KERNEL_OK")
</pallas_src>

<mosaic_0001>
module attributes {stable_mosaic.version = 11 : i64} {
  func.func @_edge_prep_kernel(%arg0: memref<32x4xf32, #tpu.memory_space<vmem>>, %arg1: memref<4x8xf32, #tpu.memory_space<vmem>>, %arg2: memref<1x8xf32, #tpu.memory_space<vmem>>, %arg3: memref<8x9xf32, #tpu.memory_space<vmem>>, %arg4: memref<32x9xf32, #tpu.memory_space<vmem>>) attributes {dimension_semantics = [], scalar_prefetch = 0 : i64, scratch_operands = 0 : i64, tpu.core_type = #tpu.core_type<tc>} {
    %c0 = arith.constant 0 : index
    %c0_0 = arith.constant 0 : index
    %0 = vector.load %arg0[%c0, %c0_0] : memref<32x4xf32, #tpu.memory_space<vmem>>, vector<32x4xf32>
    %c0_1 = arith.constant 0 : index
    %c0_2 = arith.constant 0 : index
    %1 = vector.load %arg1[%c0_1, %c0_2] : memref<4x8xf32, #tpu.memory_space<vmem>>, vector<4x8xf32>
    %cst = arith.constant dense<0.000000e+00> : vector<32x8xf32>
    %2 = tpu.matmul %0, %1, %cst {dimension_numbers = #tpu.dot_dimension_numbers<[1], [0], [0], [1], [0, 0, 1, 1], [], []>} : vector<32x4xf32>, vector<4x8xf32>, vector<32x8xf32> -> vector<32x8xf32>
    %c0_3 = arith.constant 0 : index
    %c0_4 = arith.constant 0 : index
    %3 = vector.load %arg2[%c0_3, %c0_4] : memref<1x8xf32, #tpu.memory_space<vmem>>, vector<1x8xf32>
    %4 = vector.broadcast %3 : vector<1x8xf32> to vector<32x8xf32>
    %5 = arith.addf %2, %4 : vector<32x8xf32>
    %cst_5 = arith.constant 0.000000e+00 : f32
    %6 = vector.broadcast %cst_5 : f32 to vector<32x8xf32>
    %7 = arith.maximumf %5, %6 : vector<32x8xf32>
    %c0_6 = arith.constant 0 : index
    %c0_7 = arith.constant 0 : index
    %8 = vector.load %arg3[%c0_6, %c0_7] : memref<8x9xf32, #tpu.memory_space<vmem>>, vector<8x9xf32>
    %cst_8 = arith.constant dense<0.000000e+00> : vector<32x9xf32>
    %9 = tpu.matmul %7, %8, %cst_8 {dimension_numbers = #tpu.dot_dimension_numbers<[1], [0], [0], [1], [0, 0, 1, 1], [], []>} : vector<32x8xf32>, vector<8x9xf32>, vector<32x9xf32> -> vector<32x9xf32>
    %c0_9 = arith.constant 0 : index
    %c0_10 = arith.constant 0 : index
    %10 = vector.load %arg4[%c0_9, %c0_10] : memref<32x9xf32, #tpu.memory_space<vmem>>, vector<32x9xf32>
    tpu.vector_store %arg4[%c0_9, %c0_10], %9 {strides = array<i32>} : memref<32x9xf32, #tpu.memory_space<vmem>>, vector<32x9xf32>,
    return
  }
}

module attributes {stable_mosaic.version = 11 : i64} {
  func.func @_gat_forward_kernel(%arg0: memref<16x6xf32, #tpu.memory_space<vmem>>, %arg1: memref<16x1xf32, #tpu.memory_space<vmem>>, %arg2: memref<16x16xf32, #tpu.memory_space<vmem>>, %arg3: memref<9x16x16xf32, #tpu.memory_space<vmem>>, %arg4: memref<6x16xf32, #tpu.memory_space<vmem>>, %arg5: memref<1x16xf32, #tpu.memory_space<vmem>>, %arg6: memref<16x48xf32, #tpu.memory_space<vmem>>, %arg7: memref<3x48xf32, #tpu.memory_space<vmem>>, %arg8: memref<48x3xf32, #tpu.memory_space<vmem>>, %arg9: memref<1x16xf32, #tpu.memory_space<vmem>>, %arg10: memref<16x48xf32, #tpu.memory_space<vmem>>, %arg11: memref<3x48xf32, #tpu.memory_space<vmem>>, %arg12: memref<48x3xf32, #tpu.memory_space<vmem>>, %arg13: memref<1x16xf32, #tpu.memory_space<vmem>>, %arg14: memref<16x24xf32, #tpu.memory_space<vmem>>, %arg15: memref<3x24xf32, #tpu.memory_space<vmem>>, %arg16: memref<24x3xf32, #tpu.memory_space<vmem>>, %arg17: memref<1x8xf32, #tpu.memory_space<vmem>>, %arg18: memref<2x16xf32, #tpu.memory_space<vmem>>, %arg19: memref<8x32xf32, #tpu.memory_space<vmem>>, %arg20: memref<1x32xf32, #tpu.memory_space<vmem>>, %arg21: memref<32x4xf32, #tpu.memory_space<vmem>>, %arg22: memref<1x4xf32, #tpu.memory_space<vmem>>, %arg23: memref<2x4xf32, #tpu.memory_space<vmem>>) attributes {dimension_semantics = [], scalar_prefetch = 0 : i64, scratch_operands = 0 : i64, tpu.core_type = #tpu.core_type<tc>} {
    %c0 = arith.constant 0 : index
    %c0_0 = arith.constant 0 : index
    %0 = vector.load %arg2[%c0, %c0_0] : memref<16x16xf32, #tpu.memory_space<vmem>>, vector<16x16xf32>
    %cst = arith.constant 0.000000e+00 : f32
    %1 = vector.broadcast %cst : f32 to vector<16x16xf32>
    %2 = arith.cmpf ogt, %0, %1 : vector<16x16xf32>
    %c0_1 = arith.constant 0 : index
    %c0_2 = arith.constant 0 : index
    %3 = vector.load %arg0[%c0_1, %c0_2] : memref<16x6xf32, #tpu.memory_space<vmem>>, vector<16x6xf32>
    %c0_3 = arith.constant 0 : index
    %c0_4 = arith.constant 0 : index
    %4 = vector.load %arg4[%c0_3, %c0_4] : memref<6x16xf32, #tpu.memory_space<vmem>>, vector<6x16xf32>
    %cst_5 = arith.constant dense<0.000000e+00> : vector<16x16xf32>
    %5 = tpu.matmul %3, %4, %cst_5 {dimension_numbers = #tpu.dot_dimension_numbers<[1], [0], [0], [1], [0, 0, 1, 1], [], []>} : vector<16x6xf32>, vector<6x16xf32>, vector<16x16xf32> -> vector<16x16xf32>
    %c0_6 = arith.constant 0 : index
    %c0_7 = arith.constant 0 : index
    %6 = vector.load %arg5[%c0_6, %c0_7] : memref<1x16xf32, #tpu.memory_space<vmem>>, vector<1x16xf32>
    %7 = vector.broadcast %6 : vector<1x16xf32> to vector<16x16xf32>
    %8 = arith.addf %5, %7 : vector<16x16xf32>
    %cst_8 = arith.constant 0.000000e+00 : f32
    %9 = vector.broadcast %cst_8 : f32 to vector<16x16xf32>
    %10 = arith.maximumf %8, %9 : vector<16x16xf32>
    %c0_9 = arith.constant 0 : index
    %c0_10 = arith.constant 0 : index
    %11 = vector.load %arg6[%c0_9, %c0_10] : memref<16x48xf32, #tpu.memory_space<vmem>>, vector<16x48xf32>
    %cst_11 = arith.constant dense<0.000000e+00> : vector<16x48xf32>
    %12 = tpu.matmul %10, %11, %cst_11 {dimension_numbers = #tpu.dot_dimension_numbers<[1], [0], [0], [1], [0, 0, 1, 1], [], []>} : vector<16x16xf32>, vector<16x48xf32>, vector<16x48xf32> -> vector<16x48xf32>
    %c0_12 = arith.constant 0 : index
    %c0_13 = arith.constant 0 : index
    %13 = vector.load %arg7[%c0_12, %c0_13] : memref<3x48xf32, #tpu.memory_space<vmem>>, vector<3x48xf32>
    %cst_14 = arith.constant dense<0.000000e+00> : vector<3x16xf32>
    %14 = tpu.matmul %13, %12, %cst_14 {dimension_numbers = #tpu.dot_dimension_numbers<[1], [1], [0], [0], [0, 0, 1, 0], [], []>} : vector<3x48xf32>, vector<16x48xf32>, vector<3x16xf32> -> vector<3x16xf32>
    %c0_15 = arith.constant 0 : index
    %c0_16 = arith.constant 0 : index
    %15 = vector.load %arg8[%c0_15, %c0_16] : memref<48x3xf32, #tpu.memory_space<vmem>>, vector<48x3xf32>
    %cst_17 = arith.constant dense<0.000000e+00> : vector<16x3xf32>
    %16 = tpu.matmul %12, %15, %cst_17 {dimension_numbers = #tpu.dot_dimension_numbers<[1], [0], [0], [1], [0, 0, 1, 1], [], []>} : vector<16x48xf32>, vector<48x3xf32>, vector<16x3xf32> -> vector<16x3xf32>
    %17 = vector.extract_strided_slice %16 {offsets = [0, 0], sizes = [16, 1], strides = [1, 1]} : vector<16x3xf32> to vector<16x1xf32>
    %18 = vector.extract_strided_slice %14 {offsets = [0, 0], sizes = [1, 16], strides = [1, 1]} : vector<3x16xf32> to vector<1x16xf32>
    %19 = vector.broadcast %17 : vector<16x1xf32> to vector<16x16xf32>
    %20 = vector.broadcast %18 : vector<1x16xf32> to vector<16x16xf32>
    %21 = arith.addf %19, %20 : vector<16x16xf32>
    %c0_18 = arith.constant 0 : index
    %c0_19 = arith.constant 0 : index
    %c0_20 = arith.constant 0 : index
    %22 = vector.load %arg3[%c0_18, %c0_19, %c0_20] : memref<9x16x16xf32, #tpu.memory_space<vmem>>, vector<1x16x16xf32>
    %23 = vector.shape_cast %22 : vector<1x16x16xf32> to vector<16x16xf32>
    %24 = arith.addf %21, %23 : vector<16x16xf32>
    %cst_21 = arith.constant 0.000000e+00 : f32
    %25 = vector.broadcast %cst_21 : f32 to vector<16x16xf32>
    %26 = arith.cmpf ogt, %24, %25 : vector<16x16xf32>
    %cst_22 = arith.constant 2.000000e-01 : f32
    %27 = vector.broadcast %cst_22 : f32 to vector<16x16xf32>
    %28 = arith.mulf %27, %24 : vector<16x16xf32>
    %29 = arith.select %26, %24, %28 : vector<16x16xi1>, vector<16x16xf32>
    %cst_23 = arith.constant -1.000000e+30 : f32
    %30 = vector.broadcast %cst_23 : f32 to vector<16x16xf32>
    %31 = arith.select %2, %29, %30 : vector<16x16xi1>, vector<16x16xf32>
    %cst_24 = arith.constant dense<0xFF800000> : vector<16xf32>
    %32 = vector.multi_reduction <maximumf>, %31, %cst_24 [1] : vector<16x16xf32> to vector<16xf32>
    %33 = vector.shape_cast %32 : vector<16xf32> to vector<16x1xf32>
    %34 = vector.broadcast %33 : vector<16x1xf32> to vector<16x16xf32>
    %35 = arith.subf %31, %34 : vector<16x16xf32>
    %36 = math.exp %35 : vector<16x16xf32>
    %cst_25 = arith.constant dense<0.000000e+00> : vector<16xf32>
    %37 = vector.multi_reduction <add>, %36, %cst_25 [1] : vector<16x16xf32> to vector<16xf32>
    %38 = vector.shape_cast %37 : vector<16xf32> to vector<16x1xf32>
    %39 = tpu.reciprocal %38 {approx = true} : vector<16x1xf32> -> vector<16x1xf32>
    %40 = vector.broadcast %39 : vector<16x1xf32> to vector<16x16xf32>
    %41 = arith.mulf %36, %40 : vector<16x16xf32>
    %42 = vector.extract_strided_slice %12 {offsets = [0, 0], sizes = [16, 16], strides = [1, 1]} : vector<16x48xf32> to vector<16x16xf32>
    %cst_26 = arith.constant dense<0.000000e+00> : vector<16x16xf32>
    %43 = tpu.matmul %41, %42, %cst_26 {dimension_numbers = #tpu.dot_dimension_numbers<[1], [0], [0], [1], [0, 0, 1, 1], [], []>} : vector<16x16xf32>, vector<16x16xf32>, vector<16x16xf32> -> vector<16x16xf32>
    %44 = vector.extract_strided_slice %16 {offsets = [0, 1], sizes = [16, 1], strides = [1, 1]} : vector<16x3xf32> to vector<16x1xf32>
    %45 = vector.extract_strided_slice %14 {offsets = [1, 0], sizes = [1, 16], strides = [1, 1]} : vector<3x16xf32> to vector<1x16xf32>
    %46 = vector.broadcast %44 : vector<16x1xf32> to vector<16x16xf32>
    %47 = vector.broadcast %45 : vector<1x16xf32> to vector<16x16xf32>
    %48 = arith.addf %46, %47 : vector<16x16xf32>
    %c1 = arith.constant 1 : index
    %c0_27 = arith.constant 0 : index
    %c0_28 = arith.constant 0 : index
    %49 = vector.load %arg3[%c1, %c0_27, %c0_28] : memref<9x16x16xf32, #tpu.memory_space<vmem>>, vector<1x16x16xf32>
    %50 = vector.shape_cast %49 : vector<1x16x16xf32> to vector<16x16xf32>
    %51 = arith.addf %48, %50 : vector<16x16xf32>
    %cst_29 = arith.constant 0.000000e+00 : f32
    %52 = vector.broadcast %cst_29 : f32 to vector<16x16xf32>
    %53 = arith.cmpf ogt, %51, %52 : vector<16x16xf32>
    %cst_30 = arith.constant 2.000000e-01 : f32
    %54 = vector.broadcast %cst_30 : f32 to vector<16x16xf32>
    %55 = arith.mulf %54, %51 : vector<16x16xf32>
    %56 = arith.select %53, %51, %55 : vector<16x16xi1>, vector<16x16xf32>
    %cst_31 = arith.constant -1.000000e+30 : f32
    %57 = vector.broadcast %cst_31 : f32 to vector<16x16xf32>
    %58 = arith.select %2, %56, %57 : vector<16x16xi1>, vector<16x16xf32>
    %cst_32 = arith.constant dense<0xFF800000> : vector<16xf32>
    %59 = vector.multi_reduction <maximumf>, %58, %cst_32 [1] : vector<16x16xf32> to vector<16xf32>
    %60 = vector.shape_cast %59 : vector<16xf32> to vector<16x1xf32>
    %61 = vector.broadcast %60 : vector<16x1xf32> to vector<16x16xf32>
    %62 = arith.subf %58, %61 : vector<16x16xf32>
    %63 = math.exp %62 : vector<16x16xf32>
    %cst_33 = arith.constant dense<0.000000e+00> : vector<16xf32>
    %64 = vector.multi_reduction <add>, %63, %cst_33 [1] : vector<16x16xf32> to vector<16xf32>
    %65 = vector.shape_cast %64 : vector<16xf32> to vector<16x1xf32>
    %66 = tpu.reciprocal %65 {approx = true} : vector<16x1xf32> -> vector<16x1xf32>
    %67 = vector.broadcast %66 : vector<16x1xf32> to vector<16x16xf32>
    %68 = arith.mulf %63, %67 : vector<16x16xf32>
    %69 = vector.extract_strided_slice %12 {offsets = [0, 16], sizes = [16, 16], strides = [1, 1]} : vector<16x48xf32> to vector<16x16xf32>
    %cst_34 = arith.constant dense<0.000000e+00> : vector<16x16xf32>
    %70 = tpu.matmul %68, %69, %cst_34 {dimension_numbers = #tpu.dot_dimension_numbers<[1], [0], [0], [1], [0, 0, 1, 1], [], []>} : vector<16x16xf32>, vector<16x16xf32>, vector<16x16xf32> -> vector<16x16xf32>
    %71 = arith.addf %43, %70 : vector<16x16xf32>
    %72 = vector.extract_strided_slice %16 {offsets = [0, 2], sizes = [16, 1], strides = [1, 1]} : vector<16x3xf32> to vector<16x1xf32>
    %73 = vector.extract_strided_slice %14 {offsets = [2, 0], sizes = [1, 16], strides = [1, 1]} : vector<3x16xf32> to vector<1x16xf32>
    %74 = vector.broadcast %72 : vector<16x1xf32> to vector<16x16xf32>
    %75 = vector.broadcast %73 : vector<1x16xf32> to vector<16x16xf32>
    %76 = arith.addf %74, %75 : vector<16x16xf32>
    %c2 = arith.constant 2 : index
    %c0_35 = arith.constant 0 : index
    %c0_36 = arith.constant 0 : index
    %77 = vector.load %arg3[%c2, %c0_35, %c0_36] : memref<9x16x16xf32, #tpu.memory_space<vmem>>, vector<1x16x16xf32>
    %78 = vector.shape_cast %77 : vector<1x16x16xf32> to vector<16x16xf32>
    %79 = arith.addf %76, %78 : vector<16x16xf32>
    %cst_37 = arith.constant 0.000000e+00 : f32
    %80 = vector.broadcast %cst_37 : f32 to vector<16x16xf32>
    %81 = arith.cmpf ogt, %79, %80 : vector<16x16xf32>
    %cst_38 = arith.constant 2.000000e-01 : f32
    %82 = vector.broadcast %cst_38 : f32 to vector<16x16xf32>
    %83 = arith.mulf %82, %79 : vector<16x16xf32>
    %84 = arith.select %81, %79, %83 : vector<16x16xi1>, vector<16x16xf32>
    %cst_39 = arith.constant -1.000000e+30 : f32
    %85 = vector.broadcast %cst_39 : f32 to vector<16x16xf32>
    %86 = arith.select %2, %84, %85 : vector<16x16xi1>, vector<16x16xf32>
    %cst_40 = arith.constant dense<0xFF800000> : vector<16xf32>
    %87 = vector.multi_reduction <maximumf>, %86, %cst_40 [1] : vector<16x16xf32> to vector<16xf32>
    %88 = vector.shape_cast %87 : vector<16xf32> to vector<16x1xf32>
    %89 = vector.broadcast %88 : vector<16x1xf32> to vector<16x16xf32>
    %90 = arith.subf %86, %89 : vector<16x16xf32>
    %91 = math.exp %90 : vector<16x16xf32>
    %cst_41 = arith.constant dense<0.000000e+00> : vector<16xf32>
    %92 = vector.multi_reduction <add>, %91, %cst_41 [1] : vector<16x16xf32> to vector<16xf32>
    %93 = vector.shape_cast %92 : vector<16xf32> to vector<16x1xf32>
    %94 = tpu.reciprocal %93 {approx = true} : vector<16x1xf32> -> vector<16x1xf32>
    %95 = vector.broadcast %94 : vector<16x1xf32> to vector<16x16xf32>
    %96 = arith.mulf %91, %95 : vector<16x16xf32>
    %97 = vector.extract_strided_slice %12 {offsets = [0, 32], sizes = [16, 16], strides = [1, 1]} : vector<16x48xf32> to vector<16x16xf32>
    %cst_42 = arith.constant dense<0.000000e+00> : vector<16x16xf32>
    %98 = tpu.matmul %96, %97, %cst_42 {dimension_numbers = #tpu.dot_dimension_numbers<[1], [0], [0], [1], [0, 0, 1, 1], [], []>} : vector<16x16xf32>, vector<16x16xf32>, vector<16x16xf32> -> vector<16x16xf32>
    %99 = arith.addf %71, %98 : vector<16x16xf32>
    %cst_43 = arith.constant 0.333333343 : f32
    %100 = vector.broadcast %cst_43 : f32 to vector<16x16xf32>
    %101 = arith.mulf %99, %100 : vector<16x16xf32>
    %c0_44 = arith.constant 0 : index
    %c0_45 = arith.constant 0 : index
    %102 = vector.load %arg9[%c0_44, %c0_45] : memref<1x16xf32, #tpu.memory_space<vmem>>, vector<1x16xf32>
    %103 = vector.broadcast %102 : vector<1x16xf32> to vector<16x16xf32>
    %104 = arith.addf %101, %103 : vector<16x16xf32>
    %cst_46 = arith.constant 0.000000e+00 : f32
    %105 = vector.broadcast %cst_46 : f32 to vector<16x16xf32>
    %106 = arith.maximumf %104, %105 : vector<16x16xf32>
    %c0_47 = arith.constant 0 : index
    %c0_48 = arith.constant 0 : index
    %107 = vector.load %arg10[%c0_47, %c0_48] : memref<16x48xf32, #tpu.memory_space<vmem>>, vector<16x48xf32>
    %cst_49 = arith.constant dense<0.000000e+00> : vector<16x48xf32>
    %108 = tpu.matmul %106, %107, %cst_49 {dimension_numbers = #tpu.dot_dimension_numbers<[1], [0], [0], [1], [0, 0, 1, 1], [], []>} : vector<16x16xf32>, vector<16x48xf32>, vector<16x48xf32> -> vector<16x48xf32>
    %c0_50 = arith.constant 0 : index
    %c0_51 = arith.constant 0 : index
    %109 = vector.load %arg11[%c0_50, %c0_51] : memref<3x48xf32, #tpu.memory_space<vmem>>, vector<3x48xf32>
    %cst_52 = arith.constant dense<0.000000e+00> : vector<3x16xf32>
    %110 = tpu.matmul %109, %108, %cst_52 {dimension_numbers = #tpu.dot_dimension_numbers<[1], [1], [0], [0], [0, 0, 1, 0], [], []>} : vector<3x48xf32>, vector<16x48xf32>, vector<3x16xf32> -> vector<3x16xf32>
    %c0_53 = arith.constant 0 : index
    %c0_54 = arith.constant 0 : index
    %111 = vector.load %arg12[%c0_53, %c0_54] : memref<48x3xf32, #tpu.memory_space<vmem>>, vector<48x3xf32>
    %cst_55 = arith.constant dense<0.000000e+00> : vector<16x3xf32>
    %112 = tpu.matmul %108, %111, %cst_55 {dimension_numbers = #tpu.dot_dimension_numbers<[1], [0], [0], [1], [0, 0, 1, 1], [], []>} : vector<16x48xf32>, vector<48x3xf32>, vector<16x3xf32> -> vector<16x3xf32>
    %113 = vector.extract_strided_slice %112 {offsets = [0, 0], sizes = [16, 1], strides = [1, 1]} : vector<16x3xf32> to vector<16x1xf32>
    %114 = vector.extract_strided_slice %110 {offsets = [0, 0], sizes = [1, 16], strides = [1, 1]} : vector<3x16xf32> to vector<1x16xf32>
    %115 = vector.broadcast %113 : vector<16x1xf32> to vector<16x16xf32>
    %116 = vector.broadcast %114 : vector<1x16xf32> to vector<16x16xf32>
    %117 = arith.addf %115, %116 : vector<16x16xf32>
    %c3 = arith.constant 3 : index
    %c0_56 = arith.constant 0 : index
    %c0_57 = arith.constant 0 : index
    %118 = vector.load %arg3[%c3, %c0_56, %c0_57] : memref<9x16x16xf32, #tpu.memory_space<vmem>>, vector<1x16x16xf32>
    %119 = vector.shape_cast %118 : vector<1x16x16xf32> to vector<16x16xf32>
    %120 = arith.addf %117, %119 : vector<16x16xf32>
    %cst_58 = arith.constant 0.000000e+00 : f32
    %121 = vector.broadcast %cst_58 : f32 to vector<16x16xf32>
    %122 = arith.cmpf ogt, %120, %121 : vector<16x16xf32>
    %cst_59 = arith.constant 2.000000e-01 : f32
    %123 = vector.broadcast %cst_59 : f32 to vector<16x16xf32>
    %124 = arith.mulf %123, %120 : vector<16x16xf32>
    %125 = arith.select %122, %120, %124 : vector<16x16xi1>, vector<16x16xf32>
    %cst_60 = arith.constant -1.000000e+30 : f32
    %126 = vector.broadcast %cst_60 : f32 to vector<16x16xf32>
    %127 = arith.select %2, %125, %126 : vector<16x16xi1>, vector<16x16xf32>
    %cst_61 = arith.constant dense<0xFF800000> : vector<16xf32>
    %128 = vector.multi_reduction <maximumf>, %127, %cst_61 [1] : vector<16x16xf32> to vector<16xf32>
    %129 = vector.shape_cast %128 : vector<16xf32> to vector<16x1xf32>
    %130 = vector.broadcast %129 : vector<16x1xf32> to vector<16x16xf32>
    %131 = arith.subf %127, %130 : vector<16x16xf32>
    %132 = math.exp %131 : vector<16x16xf32>
    %cst_62 = arith.constant dense<0.000000e+00> : vector<16xf32>
    %133 = vector.multi_reduction <add>, %132, %cst_62 [1] : vector<16x16xf32> to vector<16xf32>
    %134 = vector.shape_cast %133 : vector<16xf32> to vector<16x1xf32>
    %135 = tpu.reciprocal %134 {approx = true} : vector<16x1xf32> -> vector<16x1xf32>
    %136 = vector.broadcast %135 : vector<16x1xf32> to vector<16x16xf32>
    %137 = arith.mulf %132, %136 : vector<16x16xf32>
    %138 = vector.extract_strided_slice %108 {offsets = [0, 0], sizes = [16, 16], strides = [1, 1]} : vector<16x48xf32> to vector<16x16xf32>
    %cst_63 = arith.constant dense<0.000000e+00> : vector<16x16xf32>
    %139 = tpu.matmul %137, %138, %cst_63 {dimension_numbers = #tpu.dot_dimension_numbers<[1], [0], [0], [1], [0, 0, 1, 1], [], []>} : vector<16x16xf32>, vector<16x16xf32>, vector<16x16xf32> -> vector<16x16xf32>
    %140 = vector.extract_strided_slice %112 {offsets = [0, 1], sizes = [16, 1], strides = [1, 1]} : vector<16x3xf32> to vector<16x1xf32>
    %141 = vector.extract_strided_slice %110 {offsets = [1, 0], sizes = [1, 16], strides = [1, 1]} : vector<3x16xf32> to vector<1x16xf32>
    %142 = vector.broadcast %140 : vector<16x1xf32> to vector<16x16xf32>
    %143 = vector.broadcast %141 : vector<1x16xf32> to vector<16x16xf32>
    %144 = arith.addf %142, %143 : vector<16x16xf32>
    %c4 = arith.constant 4 : index
    %c0_64 = arith.constant 0 : index
    %c0_65 = arith.constant 0 : index
    %145 = vector.load %arg3[%c4, %c0_64, %c0_65] : memref<9x16x16xf32, #tpu.memory_space<vmem>>, vector<1x16x16xf32>
    %146 = vector.shape_cast %145 : vector<1x16x16xf32> to vector<16x16xf32>
    %147 = arith.addf %144, %146 : vector<16x16xf32>
    %cst_66 = arith.constant 0.000000e+00 : f32
    %148 = vector.broadcast %cst_66 : f32 to vector<16x16xf32>
    %149 = arith.cmpf ogt, %147, %148 : vector<16x16xf32>
    %cst_67 = arith.constant 2.000000e-01 : f32
    %150 = vector.broadcast %cst_67 : f32 to vector<16x16xf32>
    %151 = arith.mulf %150, %147 : vector<16x16xf32>
    %152 = arith.select %149, %147, %151 : vector<16x16xi1>, vector<16x16xf32>
    %cst_68 = arith.constant -1.000000e+30 : f32
    %153 = vector.broadcast %cst_68 : f32 to vector<16x16xf32>
    %154 = arith.select %2, %152, %153 : vector<16x16xi1>, vector<16x16xf32>
    %cst_69 = arith.constant dense<0xFF800000> : vector<16xf32>
    %155 = vector.multi_reduction <maximumf>, %154, %cst_69 [1] : vector<16x16xf32> to vector<16xf32>
    %156 = vector.shape_cast %155 : vector<16xf32> to vector<16x1xf32>
    %157 = vector.broadcast %156 : vector<16x1xf32> to vector<16x16xf32>
    %158 = arith.subf %154, %157 : vector<16x16xf32>
    %159 = math.exp %158 : vector<16x16xf32>
    %cst_70 = arith.constant dense<0.000000e+00> : vector<16xf32>
    %160 = vector.multi_reduction <add>, %159, %cst_70 [1] : vector<16x16xf32> to vector<16xf32>
    %161 = vector.shape_cast %160 : vector<16xf32> to vector<16x1xf32>
    %162 = tpu.reciprocal %161 {approx = true} : vector<16x1xf32> -> vector<16x1xf32>
    %163 = vector.broadcast %162 : vector<16x1xf32> to vector<16x16xf32>
    %164 = arith.mulf %159, %163 : vector<16x16xf32>
    %165 = vector.extract_strided_slice %108 {offsets = [0, 16], sizes = [16, 16], strides = [1, 1]} : vector<16x48xf32> to vector<16x16xf32>
    %cst_71 = arith.constant dense<0.000000e+00> : vector<16x16xf32>
    %166 = tpu.matmul %164, %165, %cst_71 {dimension_numbers = #tpu.dot_dimension_numbers<[1], [0], [0], [1], [0, 0, 1, 1], [], []>} : vector<16x16xf32>, vector<16x16xf32>, vector<16x16xf32> -> vector<16x16xf32>
    %167 = arith.addf %139, %166 : vector<16x16xf32>
    %168 = vector.extract_strided_slice %112 {offsets = [0, 2], sizes = [16, 1], strides = [1, 1]} : vector<16x3xf32> to vector<16x1xf32>
    %169 = vector.extract_strided_slice %110 {offsets = [2, 0], sizes = [1, 16], strides = [1, 1]} : vector<3x16xf32> to vector<1x16xf32>
    %170 = vector.broadcast %168 : vector<16x1xf32> to vector<16x16xf32>
    %171 = vector.broadcast %169 : vector<1x16xf32> to vector<16x16xf32>
    %172 = arith.addf %170, %171 : vector<16x16xf32>
    %c5 = arith.constant 5 : index
    %c0_72 = arith.constant 0 : index
    %c0_73 = arith.constant 0 : index
    %173 = vector.load %arg3[%c5, %c0_72, %c0_73] : memref<9x16x16xf32, #tpu.memory_space<vmem>>, vector<1x16x16xf32>
    %174 = vector.shape_cast %173 : vector<1x16x16xf32> to vector<16x16xf32>
    %175 = arith.addf %172, %174 : vector<16x16xf32>
    %cst_74 = arith.constant 0.000000e+00 : f32
    %176 = vector.broadcast %cst_74 : f32 to vector<16x16xf32>
    %177 = arith.cmpf ogt, %175, %176 : vector<16x16xf32>
    %cst_75 = arith.constant 2.000000e-01 : f32
    %178 = vector.broadcast %cst_75 : f32 to vector<16x16xf32>
    %179 = arith.mulf %178, %175 : vector<16x16xf32>
    %180 = arith.select %177, %175, %179 : vector<16x16xi1>, vector<16x16xf32>
    %cst_76 = arith.constant -1.000000e+30 : f32
    %181 = vector.broadcast %cst_76 : f32 to vector<16x16xf32>
    %182 = arith.select %2, %180, %181 : vector<16x16xi1>, vector<16x16xf32>
    %cst_77 = arith.constant dense<0xFF800000> : vector<16xf32>
    %183 = vector.multi_reduction <maximumf>, %182, %cst_77 [1] : vector<16x16xf32> to vector<16xf32>
    %184 = vector.shape_cast %183 : vector<16xf32> to vector<16x1xf32>
    %185 = vector.broadcast %184 : vector<16x1xf32> to vector<16x16xf32>
    %186 = arith.subf %182, %185 : vector<16x16xf32>
    %187 = math.exp %186 : vector<16x16xf32>
    %cst_78 = arith.constant dense<0.000000e+00> : vector<16xf32>
    %188 = vector.multi_reduction <add>, %187, %cst_78 [1] : vector<16x16xf32> to vector<16xf32>
    %189 = vector.shape_cast %188 : vector<16xf32> to vector<16x1xf32>
    %190 = tpu.reciprocal %189 {approx = true} : vector<16x1xf32> -> vector<16x1xf32>
    %191 = vector.broadcast %190 : vector<16x1xf32> to vector<16x16xf32>
    %192 = arith.mulf %187, %191 : vector<16x16xf32>
    %193 = vector.extract_strided_slice %108 {offsets = [0, 32], sizes = [16, 16], strides = [1, 1]} : vector<16x48xf32> to vector<16x16xf32>
    %cst_79 = arith.constant dense<0.000000e+00> : vector<16x16xf32>
    %194 = tpu.matmul %192, %193, %cst_79 {dimension_numbers = #tpu.dot_dimension_numbers<[1], [0], [0], [1], [0, 0, 1, 1], [], []>} : vector<16x16xf32>, vector<16x16xf32>, vector<16x16xf32> -> vector<16x16xf32>
    %195 = arith.addf %167, %194 : vector<16x16xf32>
    %cst_80 = arith.constant 0.333333343 : f32
    %196 = vector.broadcast %cst_80 : f32 to vector<16x16xf32>
    %197 = arith.mulf %195, %196 : vector<16x16xf32>
    %c0_81 = arith.constant 0 : index
    %c0_82 = arith.constant 0 : index
    %198 = vector.load %arg13[%c0_81, %c0_82] : memref<1x16xf32, #tpu.memory_space<vmem>>, vector<1x16xf32>
    %199 = vector.broadcast %198 : vector<1x16xf32> to vector<16x16xf32>
    %200 = arith.addf %197, %199 : vector<16x16xf32>
    %cst_83 = arith.constant 0.000000e+00 : f32
    %201 = vector.broadcast %cst_83 : f32 to vector<16x16xf32>
    %202 = arith.maximumf %200, %201 : vector<16x16xf32>
    %c0_84 = arith.constant 0 : index
    %c0_85 = arith.constant 0 : index
    %203 = vector.load %arg14[%c0_84, %c0_85] : memref<16x24xf32, #tpu.memory_space<vmem>>, vector<16x24xf32>
    %cst_86 = arith.constant dense<0.000000e+00> : vector<16x24xf32>
    %204 = tpu.matmul %202, %203, %cst_86 {dimension_numbers = #tpu.dot_dimension_numbers<[1], [0], [0], [1], [0, 0, 1, 1], [], []>} : vector<16x16xf32>, vector<16x24xf32>, vector<16x24xf32> -> vector<16x24xf32>
    %c0_87 = arith.constant 0 : index
    %c0_88 = arith.constant 0 : index
    %205 = vector.load %arg15[%c0_87, %c0_88] : memref<3x24xf32, #tpu.memory_space<vmem>>, vector<3x24xf32>
    %cst_89 = arith.constant dense<0.000000e+00> : vector<3x16xf32>
    %206 = tpu.matmul %205, %204, %cst_89 {dimension_numbers = #tpu.dot_dimension_numbers<[1], [1], [0], [0], [0, 0, 1, 0], [], []>} : vector<3x24xf32>, vector<16x24xf32>, vector<3x16xf32> -> vector<3x16xf32>
    %c0_90 = arith.constant 0 : index
    %c0_91 = arith.constant 0 : index
    %207 = vector.load %arg16[%c0_90, %c0_91] : memref<24x3xf32, #tpu.memory_space<vmem>>, vector<24x3xf32>
    %cst_92 = arith.constant dense<0.000000e+00> : vector<16x3xf32>
    %208 = tpu.matmul %204, %207, %cst_92 {dimension_numbers = #tpu.dot_dimension_numbers<[1], [0], [0], [1], [0, 0, 1, 1], [], []>} : vector<16x24xf32>, vector<24x3xf32>, vector<16x3xf32> -> vector<16x3xf32>
    %209 = vector.extract_strided_slice %208 {offsets = [0, 0], sizes = [16, 1], strides = [1, 1]} : vector<16x3xf32> to vector<16x1xf32>
    %210 = vector.extract_strided_slice %206 {offsets = [0, 0], sizes = [1, 16], strides = [1, 1]} : vector<3x16xf32> to vector<1x16xf32>
    %211 = vector.broadcast %209 : vector<16x1xf32> to vector<16x16xf32>
    %212 = vector.broadcast %210 : vector<1x16xf32> to vector<16x16xf32>
    %213 = arith.addf %211, %212 : vector<16x16xf32>
    %c6 = arith.constant 6 : index
    %c0_93 = arith.constant 0 : index
    %c0_94 = arith.constant 0 : index
    %214 = vector.load %arg3[%c6, %c0_93, %c0_94] : memref<9x16x16xf32, #tpu.memory_space<vmem>>, vector<1x16x16xf32>
    %215 = vector.shape_cast %214 : vector<1x16x16xf32> to vector<16x16xf32>
    %216 = arith.addf %213, %215 : vector<16x16xf32>
    %cst_95 = arith.constant 0.000000e+00 : f32
    %217 = vector.broadcast %cst_95 : f32 to vector<16x16xf32>
    %218 = arith.cmpf ogt, %216, %217 : vector<16x16xf32>
    %cst_96 = arith.constant 2.000000e-01 : f32
    %219 = vector.broadcast %cst_96 : f32 to vector<16x16xf32>
    %220 = arith.mulf %219, %216 : vector<16x16xf32>
    %221 = arith.select %218, %216, %220 : vector<16x16xi1>, vector<16x16xf32>
    %cst_97 = arith.constant -1.000000e+30 : f32
    %222 = vector.broadcast %cst_97 : f32 to vector<16x16xf32>
    %223 = arith.select %2, %221, %222 : vector<16x16xi1>, vector<16x16xf32>
    %cst_98 = arith.constant dense<0xFF800000> : vector<16xf32>
    %224 = vector.multi_reduction <maximumf>, %223, %cst_98 [1] : vector<16x16xf32> to vector<16xf32>
    %225 = vector.shape_cast %224 : vector<16xf32> to vector<16x1xf32>
    %226 = vector.broadcast %225 : vector<16x1xf32> to vector<16x16xf32>
    %227 = arith.subf %223, %226 : vector<16x16xf32>
    %228 = math.exp %227 : vector<16x16xf32>
    %cst_99 = arith.constant dense<0.000000e+00> : vector<16xf32>
    %229 = vector.multi_reduction <add>, %228, %cst_99 [1] : vector<16x16xf32> to vector<16xf32>
    %230 = vector.shape_cast %229 : vector<16xf32> to vector<16x1xf32>
    %231 = tpu.reciprocal %230 {approx = true} : vector<16x1xf32> -> vector<16x1xf32>
    %232 = vector.broadcast %231 : vector<16x1xf32> to vector<16x16xf32>
    %233 = arith.mulf %228, %232 : vector<16x16xf32>
    %234 = vector.extract_strided_slice %204 {offsets = [0, 0], sizes = [16, 8], strides = [1, 1]} : vector<16x24xf32> to vector<16x8xf32>
    %cst_100 = arith.constant dense<0.000000e+00> : vector<16x8xf32>
    %235 = tpu.matmul %233, %234, %cst_100 {dimension_numbers = #tpu.dot_dimension_numbers<[1], [0], [0], [1], [0, 0, 1, 1], [], []>} : vector<16x16xf32>, vector<16x8xf32>, vector<16x8xf32> -> vector<16x8xf32>
    %236 = vector.extract_strided_slice %208 {offsets = [0, 1], sizes = [16, 1], strides = [1, 1]} : vector<16x3xf32> to vector<16x1xf32>
    %237 = vector.extract_strided_slice %206 {offsets = [1, 0], sizes = [1, 16], strides = [1, 1]} : vector<3x16xf32> to vector<1x16xf32>
    %238 = vector.broadcast %236 : vector<16x1xf32> to vector<16x16xf32>
    %239 = vector.broadcast %237 : vector<1x16xf32> to vector<16x16xf32>
    %240 = arith.addf %238, %239 : vector<16x16xf32>
    %c7 = arith.constant 7 : index
    %c0_101 = arith.constant 0 : index
    %c0_102 = arith.constant 0 : index
    %241 = vector.load %arg3[%c7, %c0_101, %c0_102] : memref<9x16x16xf32, #tpu.memory_space<vmem>>, vector<1x16x16xf32>
    %242 = vector.shape_cast %241 : vector<1x16x16xf32> to vector<16x16xf32>
    %243 = arith.addf %240, %242 : vector<16x16xf32>
    %cst_103 = arith.constant 0.000000e+00 : f32
    %244 = vector.broadcast %cst_103 : f32 to vector<16x16xf32>
    %245 = arith.cmpf ogt, %243, %244 : vector<16x16xf32>
    %cst_104 = arith.constant 2.000000e-01 : f32
    %246 = vector.broadcast %cst_104 : f32 to vector<16x16xf32>
    %247 = arith.mulf %246, %243 : vector<16x16xf32>
    %248 = arith.select %245, %243, %247 : vector<16x16xi1>, vector<16x16xf32>
    %cst_105 = arith.constant -1.000000e+30 : f32
    %249 = vector.broadcast %cst_105 : f32 to vector<16x16xf32>
    %250 = arith.select %2, %248, %249 : vector<16x16xi1>, vector<16x16xf32>
    %cst_106 = arith.constant dense<0xFF800000> : vector<16xf32>
    %251 = vector.multi_reduction <maximumf>, %250, %cst_106 [1] : vector<16x16xf32> to vector<16xf32>
    %252 = vector.shape_cast %251 : vector<16xf32> to vector<16x1xf32>
    %253 = vector.broadcast %252 : vector<16x1xf32> to vector<16x16xf32>
    %254 = arith.subf %250, %253 : vector<16x16xf32>
    %255 = math.exp %254 : vector<16x16xf32>
    %cst_107 = arith.constant dense<0.000000e+00> : vector<16xf32>
    %256 = vector.multi_reduction <add>, %255, %cst_107 [1] : vector<16x16xf32> to vector<16xf32>
    %257 = vector.shape_cast %256 : vector<16xf32> to vector<16x1xf32>
    %258 = tpu.reciprocal %257 {approx = true} : vector<16x1xf32> -> vector<16x1xf32>
    %259 = vector.broadcast %258 : vector<16x1xf32> to vector<16x16xf32>
    %260 = arith.mulf %255, %259 : vector<16x16xf32>
    %261 = vector.extract_strided_slice %204 {offsets = [0, 8], sizes = [16, 8], strides = [1, 1]} : vector<16x24xf32> to vector<16x8xf32>
    %cst_108 = arith.constant dense<0.000000e+00> : vector<16x8xf32>
    %262 = tpu.matmul %260, %261, %cst_108 {dimension_numbers = #tpu.dot_dimension_numbers<[1], [0], [0], [1], [0, 0, 1, 1], [], []>} : vector<16x16xf32>, vector<16x8xf32>, vector<16x8xf32> -> vector<16x8xf32>
    %263 = arith.addf %235, %262 : vector<16x8xf32>
    %264 = vector.extract_strided_slice %208 {offsets = [0, 2], sizes = [16, 1], strides = [1, 1]} : vector<16x3xf32> to vector<16x1xf32>
    %265 = vector.extract_strided_slice %206 {offsets = [2, 0], sizes = [1, 16], strides = [1, 1]} : vector<3x16xf32> to vector<1x16xf32>
    %266 = vector.broadcast %264 : vector<16x1xf32> to vector<16x16xf32>
    %267 = vector.broadcast %265 : vector<1x16xf32> to vector<16x16xf32>
    %268 = arith.addf %266, %267 : vector<16x16xf32>
    %c8 = arith.constant 8 : index
    %c0_109 = arith.constant 0 : index
    %c0_110 = arith.constant 0 : index
    %269 = vector.load %arg3[%c8, %c0_109, %c0_110] : memref<9x16x16xf32, #tpu.memory_space<vmem>>, vector<1x16x16xf32>
    %270 = vector.shape_cast %269 : vector<1x16x16xf32> to vector<16x16xf32>
    %271 = arith.addf %268, %270 : vector<16x16xf32>
    %cst_111 = arith.constant 0.000000e+00 : f32
    %272 = vector.broadcast %cst_111 : f32 to vector<16x16xf32>
    %273 = arith.cmpf ogt, %271, %272 : vector<16x16xf32>
    %cst_112 = arith.constant 2.000000e-01 : f32
    %274 = vector.broadcast %cst_112 : f32 to vector<16x16xf32>
    %275 = arith.mulf %274, %271 : vector<16x16xf32>
    %276 = arith.select %273, %271, %275 : vector<16x16xi1>, vector<16x16xf32>
    %cst_113 = arith.constant -1.000000e+30 : f32
    %277 = vector.broadcast %cst_113 : f32 to vector<16x16xf32>
    %278 = arith.select %2, %276, %277 : vector<16x16xi1>, vector<16x16xf32>
    %cst_114 = arith.constant dense<0xFF800000> : vector<16xf32>
    %279 = vector.multi_reduction <maximumf>, %278, %cst_114 [1] : vector<16x16xf32> to vector<16xf32>
    %280 = vector.shape_cast %279 : vector<16xf32> to vector<16x1xf32>
    %281 = vector.broadcast %280 : vector<16x1xf32> to vector<16x16xf32>
    %282 = arith.subf %278, %281 : vector<16x16xf32>
    %283 = math.exp %282 : vector<16x16xf32>
    %cst_115 = arith.constant dense<0.000000e+00> : vector<16xf32>
    %284 = vector.multi_reduction <add>, %283, %cst_115 [1] : vector<16x16xf32> to vector<16xf32>
    %285 = vector.shape_cast %284 : vector<16xf32> to vector<16x1xf32>
    %286 = tpu.reciprocal %285 {approx = true} : vector<16x1xf32> -> vector<16x1xf32>
    %287 = vector.broadcast %286 : vector<16x1xf32> to vector<16x16xf32>
    %288 = arith.mulf %283, %287 : vector<16x16xf32>
    %289 = vector.extract_strided_slice %204 {offsets = [0, 16], sizes = [16, 8], strides = [1, 1]} : vector<16x24xf32> to vector<16x8xf32>
    %cst_116 = arith.constant dense<0.000000e+00> : vector<16x8xf32>
    %290 = tpu.matmul %288, %289, %cst_116 {dimension_numbers = #tpu.dot_dimension_numbers<[1], [0], [0], [1], [0, 0, 1, 1], [], []>} : vector<16x16xf32>, vector<16x8xf32>, vector<16x8xf32> -> vector<16x8xf32>
    %291 = arith.addf %263, %290 : vector<16x8xf32>
    %cst_117 = arith.constant 0.333333343 : f32
    %292 = vector.broadcast %cst_117 : f32 to vector<16x8xf32>
    %293 = arith.mulf %291, %292 : vector<16x8xf32>
    %c0_118 = arith.constant 0 : index
    %c0_119 = arith.constant 0 : index
    %294 = vector.load %arg17[%c0_118, %c0_119] : memref<1x8xf32, #tpu.memory_space<vmem>>, vector<1x8xf32>
    %295 = vector.broadcast %294 : vector<1x8xf32> to vector<16x8xf32>
    %296 = arith.addf %293, %295 : vector<16x8xf32>
    %cst_120 = arith.constant 0.000000e+00 : f32
    %297 = vector.broadcast %cst_120 : f32 to vector<16x8xf32>
    %298 = arith.maximumf %296, %297 : vector<16x8xf32>
    %c0_121 = arith.constant 0 : index
    %c0_122 = arith.constant 0 : index
    %299 = vector.load %arg1[%c0_121, %c0_122] : memref<16x1xf32, #tpu.memory_space<vmem>>, vector<16x1xf32>
    %300 = vector.broadcast %299 : vector<16x1xf32> to vector<16x8xf32>
    %301 = arith.mulf %298, %300 : vector<16x8xf32>
    %c0_123 = arith.constant 0 : index
    %c0_124 = arith.constant 0 : index
    %302 = vector.load %arg18[%c0_123, %c0_124] : memref<2x16xf32, #tpu.memory_space<vmem>>, vector<2x16xf32>
    %cst_125 = arith.constant dense<0.000000e+00> : vector<2x8xf32>
    %303 = tpu.matmul %302, %301, %cst_125 {dimension_numbers = #tpu.dot_dimension_numbers<[1], [0], [0], [1], [0, 0, 1, 1], [], []>} : vector<2x16xf32>, vector<16x8xf32>, vector<2x8xf32> -> vector<2x8xf32>
    %c0_126 = arith.constant 0 : index
    %c0_127 = arith.constant 0 : index
    %304 = vector.load %arg19[%c0_126, %c0_127] : memref<8x32xf32, #tpu.memory_space<vmem>>, vector<8x32xf32>
    %cst_128 = arith.constant dense<0.000000e+00> : vector<2x32xf32>
    %305 = tpu.matmul %303, %304, %cst_128 {dimension_numbers = #tpu.dot_dimension_numbers<[1], [0], [0], [1], [0, 0, 1, 1], [], []>} : vector<2x8xf32>, vector<8x32xf32>, vector<2x32xf32> -> vector<2x32xf32>
    %c0_129 = arith.constant 0 : index
    %c0_130 = arith.constant 0 : index
    %306 = vector.load %arg20[%c0_129, %c0_130] : memref<1x32xf32, #tpu.memory_space<vmem>>, vector<1x32xf32>
    %307 = vector.broadcast %306 : vector<1x32xf32> to vector<2x32xf32>
    %308 = arith.addf %305, %307 : vector<2x32xf32>
    %cst_131 = arith.constant 0.000000e+00 : f32
    %309 = vector.broadcast %cst_131 : f32 to vector<2x32xf32>
    %310 = arith.maximumf %308, %309 : vector<2x32xf32>
    %c0_132 = arith.constant 0 : index
    %c0_133 = arith.constant 0 : index
    %311 = vector.load %arg21[%c0_132, %c0_133] : memref<32x4xf32, #tpu.memory_space<vmem>>, vector<32x4xf32>
    %cst_134 = arith.constant dense<0.000000e+00> : vector<2x4xf32>
    %312 = tpu.matmul %310, %311, %cst_134 {dimension_numbers = #tpu.dot_dimension_numbers<[1], [0], [0], [1], [0, 0, 1, 1], [], []>} : vector<2x32xf32>, vector<32x4xf32>, vector<2x4xf32> -> vector<2x4xf32>
    %c0_135 = arith.constant 0 : index
    %c0_136 = arith.constant 0 : index
    %313 = vector.load %arg22[%c0_135, %c0_136] : memref<1x4xf32, #tpu.memory_space<vmem>>, vector<1x4xf32>
    %314 = vector.broadcast %313 : vector<1x4xf32> to vector<2x4xf32>
    %315 = arith.addf %312, %314 : vector<2x4xf32>
    %cst_137 = arith.constant 0.000000e+00 : f32
    %316 = vector.broadcast %cst_137 : f32 to vector<2x4xf32>
    %317 = arith.maximumf %315, %316 : vector<2x4xf32>
    %c0_138 = arith.constant 0 : index
    %c0_139 = arith.constant 0 : index
    %318 = vector.load %arg23[%c0_138, %c0_139] : memref<2x4xf32, #tpu.memory_space<vmem>>, vector<2x4xf32>
    tpu.vector_store %arg23[%c0_138, %c0_139], %317 {strides = array<i32>} : memref<2x4xf32, #tpu.memory_space<vmem>>, vector<2x4xf32>,
    return
  }
}

</mosaic_0001>

<bundles_post_ra>
// kernel: gat_model_forward.2
= control target key start
LH: loop header
LB: loop body
LE: loop exit
PB: predicated region body
PF: predicated region fallthrough
CT: control target
= control target key end

     0   :  { %vm39_vm0 = vcmask 1043456   ;;  %vm26_vm1 = vcmask 31744   ;;  %vm77_vm2 = vcmask 64512   ;;  %vm119_vm3 = vcmask 72704   ;;  %s198_s1 = inlined_call_operand.vmem [shape: f32[4,8], index: 1, kind: input, shape index: {}]   ;;  %s199_s0 = inlined_call_operand.vmem [shape: f32[32,4], index: 0, kind: input, shape index: {}]   ;;  %s200_s2 = inlined_call_operand.vmem [shape: f32[1,8], index: 2, kind: input, shape index: {}]   ;;  %s201_s3 = inlined_call_operand.vmem [shape: f32[8,9], index: 3, kind: input, shape index: {}]   ;;  %s202_s4 = inlined_call_operand.vmem [shape: f32[32,9], index: 4, kind: output, shape index: {}]  }
   0x1   :  { %v21_v0 = vld [vmem:[%s198_s1] sm:$0xf]  ;;  %v19_v1 = vld [vmem:[%s199_s0 + $0x10] sm:$0xff]  ;;  %v20_v3 = vld [vmem:[%s199_s0 + $0x18] sm:$0xff] }
   0x2   :  { %137 = vmatpush.msk.msra.mxu2 %vm39_vm0, %v21_v0  ;;  %128 = vmatpush.msk.msra.mxu0 %vm39_vm0, %v21_v0  ;;  %v17_v2 = vld [vmem:[%s199_s0] sm:$0xff]  ;;  %v18_v4 = vld [vmem:[%s199_s0 + $0x8] sm:$0xff] }
   0x3   :  { %131 = vmatmul.msk.f32.vlgmr.msra.gmra.mxu2 %vm26_vm1, %v19_v1  ;;  %129 = vmatmul.msk.f32.vlgmr.msra.gmra.mxu0 %vm26_vm1, %v17_v2  ;;  %v76_v5 = vld [vmem:[%s201_s3] sm:$0xff] }
   0x4   :  { %138 = vmatpush.msra.mxu3 %v76_v5  ;;  %105 = vmatpush.msra.mxu1 %v76_v5  ;;  %v139_v6 = vld [vmem:[%s200_s2] ss:$0 sm:$0xff] }
   0xb   :  { %132 = vmatmul.msk.f32.gmra.mxu2 %vm26_vm1, %v20_v3  ;;  %130 = vmatmul.msk.f32.gmra.mxu0 %vm26_vm1, %v18_v4 }
  0x80   :  { %v60_v7 = vpop.f32.mrf.mxu0 }
  0x81   :  { %v61_v8 = vadd.f32 %v139_v6, %v60_v7 }
  0x83   :  { %v72_v9 = vmax.f32 %v61_v8, 0.0 }
  0x85   :  { %133 = vmatmul.msk.f32.vlgmr.msra.gmra.mxu1 %vm77_vm2, %v72_v9 }
  0x86   :  { %v66_v10 = vpop.f32.mrf.mxu2 }
  0x87   :  { %v67_v11 = vadd.f32 %v139_v6, %v66_v10 }
  0x88   :  { %v63_v12 = vpop.f32.mrf.mxu0 }
  0x89   :  { %v74_v13 = vmax.f32 %v67_v11, 0.0  ;;  %v64_v14 = vadd.f32 %v139_v6, %v63_v12 }
  0x8b   :  { %135 = vmatmul.msk.f32.vlgmr.msra.gmra.mxu3 %vm77_vm2, %v74_v13  ;;  %v73_v15 = vmax.f32 %v64_v14, 0.0 }
  0x8d   :  { %134 = vmatmul.msk.f32.gmra.mxu1 %vm77_vm2, %v73_v15 }
  0x8e   :  { %v69_v16 = vpop.f32.mrf.mxu2 }
  0x8f   :  { %v70_v17 = vadd.f32 %v139_v6, %v69_v16 }
  0x91   :  { %v75_v18 = vmax.f32 %v70_v17, 0.0 }
  0x93   :  { %136 = vmatmul.msk.f32.gmra.mxu3 %vm77_vm2, %v75_v18 }
 0x102   :  { %v107_v19 = vpop.f32.mrf.mxu1 }
 0x103   :  { %120 = vst.msk [vmem:[%s202_s4] sm:$0xff] %vm119_vm3, %v107_v19 }
 0x10a   :  { %v110_v20 = vpop.f32.mrf.mxu1 }
 0x10b   :  { %121 = vst.msk [vmem:[%s202_s4 + $0x8] sm:$0xff] %vm119_vm3, %v110_v20 }
 0x10e   :  { %v113_v21 = vpop.f32.mrf.mxu3 }
 0x10f   :  { %122 = vst.msk [vmem:[%s202_s4 + $0x10] sm:$0xff] %vm119_vm3, %v113_v21 }
 0x116   :  { %v116_v22 = vpop.f32.mrf.mxu3 }
 0x117   :  { %123 = vst.msk [vmem:[%s202_s4 + $0x18] sm:$0xff] %vm119_vm3, %v116_v22 }

// kernel: gat_model_forward.3
= control target key start
LH: loop header
LB: loop body
LE: loop exit
PB: predicated region body
PF: predicated region fallthrough
CT: control target
= control target key end

     0   :  { %s1972_s0 = inlined_call_operand.vmem [shape: f32[16,6], index: 0, kind: input, shape index: {}]   ;;  %s1973_s1 = inlined_call_operand.vmem [shape: f32[16,1], index: 1, kind: input, shape index: {}]   ;;  %s1974_s2 = inlined_call_operand.vmem [shape: f32[16,16], index: 2, kind: input, shape index: {}]   ;;  %s1975_s3 = inlined_call_operand.vmem [shape: f32[9,16,16], index: 3, kind: input, shape index: {}]   ;;  %s1976_s4 = inlined_call_operand.vmem [shape: f32[6,16], index: 4, kind: input, shape index: {}]   ;;  %s1977_s5 = inlined_call_operand.vmem [shape: f32[1,16], index: 5, kind: input, shape index: {}]   ;;  %s1978_s6 = inlined_call_operand.vmem [shape: f32[16,48], index: 6, kind: input, shape index: {}]   ;;  %s1979_s7 = inlined_call_operand.vmem [shape: f32[3,48], index: 7, kind: input, shape index: {}]   ;;  %s1980_s8 = inlined_call_operand.vmem [shape: f32[48,3], index: 8, kind: input, shape index: {}]   ;;  %s1981_s9 = inlined_call_operand.vmem [shape: f32[1,16], index: 9, kind: input, shape index: {}]   ;;  %s1982_s10 = inlined_call_operand.vmem [shape: f32[16,48], index: 10, kind: input, shape index: {}]   ;;  %s1983_s11 = inlined_call_operand.vmem [shape: f32[3,48], index: 11, kind: input, shape index: {}]   ;;  %s1984_s12 = inlined_call_operand.vmem [shape: f32[48,3], index: 12, kind: input, shape index: {}]   ;;  %s1985_s13 = inlined_call_operand.vmem [shape: f32[1,16], index: 13, kind: input, shape index: {}]   ;;  %s1986_s14 = inlined_call_operand.vmem [shape: f32[16,24], index: 14, kind: input, shape index: {}]   ;;  %s1987_s15 = inlined_call_operand.vmem [shape: f32[3,24], index: 15, kind: input, shape index: {}]   ;;  %s1988_s16 = inlined_call_operand.vmem [shape: f32[24,3], index: 16, kind: input, shape index: {}]   ;;  %s1989_s17 = inlined_call_operand.vmem [shape: f32[1,8], index: 17, kind: input, shape index: {}]   ;;  %s1990_s18 = inlined_call_operand.vmem [shape: f32[2,16], index: 18, kind: input, shape index: {}]   ;;  %s1991_s19 = inlined_call_operand.vmem [shape: f32[8,32], index: 19, kind: input, shape index: {}]   ;;  %s1992_s20 = inlined_call_operand.vmem [shape: f32[1,32], index: 20, kind: input, shape index: {}]   ;;  %s1993_s21 = inlined_call_operand.vmem [shape: f32[32,4], index: 21, kind: input, shape index: {}]   ;;  %s1994_s22 = inlined_call_operand.vmem [shape: f32[1,4], index: 22, kind: input, shape index: {}]   ;;  %s1995_s23 = inlined_call_operand.hbm [shape: f32[2,4], index: 23, kind: output, shape index: {}]  }
   0x1   :  { %2001 = sst [smem:[#allocation5_spill]] %s1972_s0 }
   0x2   :  { %2002 = sst [smem:[#allocation6_spill]] %s1973_s1 }
   0x3   :  { %2003 = sst [smem:[#allocation7_spill]] %s1974_s2 }
   0x4   :  { %2004 = sst [smem:[#allocation8_spill]] %s1975_s3 }
   0x5   :  { %2005 = sst [smem:[#allocation9_spill]] %s1976_s4 }
   0x6   :  { %2006 = sst [smem:[#allocation10_spill]] %s1977_s5 }
   0x7   :  { %2007 = sst [smem:[#allocation11_spill]] %s1978_s6 }
   0x8   :  { %2008 = sst [smem:[#allocation12_spill]] %s1979_s7 }
   0x9   :  { %s2009_s24 = sld [smem:[#allocation9_spill]]  ;;  %vm93_vm0 = vcmask 1045504   ;;  %vm86_vm1 = vcmask 48128  }
   0xa   :  { %s2010_s1 = sld [smem:[#allocation5_spill]] }
   0xf   :  { %v81_v0 = vld [vmem:[%s2009_s24] sm:$0x3f] }
  0x10   :  { %v79_v1 = vld [vmem:[%s2010_s1] sm:$0xff]  ;;  %1263 = vmatpush.msk.msra.mxu0 %vm93_vm0, %v81_v0 }
  0x11   :  { %1264 = vmatmul.msk.f32.vlgmr.msra.gmra.mxu0 %vm86_vm1, %v79_v1 }
  0x12   :  { %28 = vsyncpa [#allocation3], 0  ;;  %v80_v2 = vld [vmem:[%s2010_s1 + $0x8] sm:$0xff]  ;;  %s2011_s7 = sld [smem:[#allocation11_spill]]  ;;  %v189_v6 = vld [vmem:[%s1980_s8 + $0x20] sm:$0xff]  ;;  %vm124_vm2 = vcmask 130048  }
  0x13   :  { %v190_v5 = vld [vmem:[%s1980_s8 + $0x28] sm:$0xff]  ;;  %v188_v7 = vld [vmem:[%s1980_s8 + $0x18] sm:$0xff]  ;;  %v187_v8 = vld [vmem:[%s1980_s8 + $0x10] sm:$0xff]  ;;  %v1483_v18 = vmov 1   ;;  %vm155_vm3 = vcmask 392192   ;;  %s2013_s0 = sld [smem:[#allocation12_spill]] }
  0x14   :  { %201 = vmatpush.msra.mxu3 %v190_v5  ;;  %v186_v9 = vld [vmem:[%s1980_s8 + $0x8] sm:$0xff]  ;;  %v185_v17 = vld [vmem:[%s1980_s8] sm:$0xff]  ;;  %1331 = vset.pattern.permute.xlu0 %v1483_v18  ;;  %v1484_v22 = vmov 0   ;;  %v1485_v25 = vmov 2   ;;  %s2014_s24 = sld [smem:[#allocation8_spill]]  ;;  %s1486_s25 = smov 112  }
  0x15   :  { %1333 = vset.pattern.permute.xlu1 %v1483_v18  ;;  %1335 = vset.pattern.permute.xlu2 %v1484_v22  ;;  %s2015_s2 = sld [smem:[#allocation7_spill]]  ;;  %s1487_s5 = smov 96  }
  0x16   :  { %202 = vmatpush.msra.mxu3 %v189_v6  ;;  %s1489_s26 = smov [#allocation2]  }
  0x18   :  { %v123_v3 = vld [vmem:[%s2011_s7 + $0x8] sm:$0xff]  ;;  %v122_v4 = vld [vmem:[%s2011_s7] sm:$0xff]  ;;  %203 = vmatpush.msra.mxu3 %v188_v7  ;;  %s2012_s7 = sld [smem:[#allocation10_spill]] }
  0x19   :  { %1265 = vmatmul.msk.f32.gmra.mxu0 %vm86_vm1, %v80_v2  ;;  %145 = vmatpush.msra.mxu1 %v123_v3  ;;  %v154_v21 = vld [vmem:[%s2013_s0] sm:$0x7] }
  0x1a   :  { %204 = vmatpush.msra.mxu3 %v187_v8  ;;  %v228_v31 = vld [vmem:[%s2014_s24 + $0x8] sm:$0xff]  ;;  %v1273_v32 = vld [vmem:[%s2014_s24 + $0x10] sm:$0xff]  ;;  %v1274_v43 = vld [vmem:[%s2014_s24 + $0x18] sm:$0xff] }
  0x1b   :  { %146 = vmatpush.msra.mxu1 %v122_v4  ;;  %v1684_v36 = vld [vmem:[%s2015_s2] sm:$0xff]  ;;  %v1690_v41 = vld [vmem:[%s2015_s2 + $0x8] sm:$0xff]  ;;  %s1252_s2 = sshll.u32 %s1489_s26, 4  ;;  %s1253_s2 = int_to_ptr.vmem [resolvable:$true] %s1252_s2 }
  0x1c   :  { %205 = vmatpush.msra.mxu3 %v186_v9  ;;  %vm77_vm4 = vcmp.gt.f32.partialorder %v1684_v36, 0.0  ;;  %v227_v45 = vld [vmem:[%s2014_s24] sm:$0xff]  ;;  %vm78_vm7 = vcmp.gt.f32.partialorder %v1690_v41, 0.0  ;;  %v1280_v0 = vld [vmem:[%s2014_s24 + $0x28] sm:$0xff] }
  0x1d   :  { %v1279_v1 = vld [vmem:[%s2014_s24 + $0x20] sm:$0xff] }
  0x1e   :  { %v1379_v10 = vld [vmem:[%s2012_s7] ss:$0 sm:$0xff]  ;;  %206 = vmatpush.msra.mxu3 %v185_v17 }
  0x8e   :  { %v114_v11 = vpop.f32.mrf.mxu0 }
  0x8f   :  { %v115_v12 = vadd.f32 %v1379_v10, %v114_v11 }
  0x91   :  { %v120_v13 = vmax.f32 %v115_v12, 0.0 }
  0x93   :  { %1266 = vmatmul.msk.f32.vlgmr.msra.gmra.mxu1 %vm124_vm2, %v120_v13 }
  0x96   :  { %v117_v14 = vpop.f32.mrf.mxu0 }
  0x97   :  { %v118_v15 = vadd.f32 %v1379_v10, %v117_v14 }
  0x99   :  { %v121_v16 = vmax.f32 %v118_v15, 0.0 }
  0x9b   :  { %1267 = vmatmul.msk.f32.gmra.mxu1 %vm124_vm2, %v121_v16 }
 0x110   :  { %v1650_v19 = vpop.f32.mrf.mxu1 }
 0x111   :  { %1271 = vmatmul.msk.f32.vlgmr.msra.gmra.mxu3 %vm155_vm3, %v1650_v19 }
 0x118   :  { %v1654_v20 = vpop.f32.mrf.mxu1 }
 0x119   :  { %1268 = vmatpush.xpose.msk.msra.mxu2 %vm155_vm3, %v1654_v20  ;;  %1272 = vmatmul.msk.f32.gmra.mxu3 %vm155_vm3, %v1654_v20  ;;  %v1337_v16 = vpack.i.bf16 %v1650_v19, %v1654_v20 }
 0x11a   :  { %362 = vmatpush.msrb.mxu0 %v1654_v20 }
 0x11c   :  { %363 = vmatpush.msrb.mxu0 %v1650_v19 }
 0x11d   :  { %1269 = vmatpush.xpose.msk.msra.mxu2 %vm155_vm3, %v1650_v19 }
 0x120   :  { %1270 = vmatmul.msk.f32.vlgmr.msra.gmra.mxu2 %vm155_vm3, %v154_v21 }
 0x194   :  { %v208_v23 = vpop.f32.mrf.mxu3 }
 0x195   :  { %262 = vperm.xlu0 %1331, %v208_v23  }
 0x19c   :  { %v211_v24 = vpop.f32.mrf.mxu3 }
 0x19d   :  { %1332 = vset.pattern.permute.xlu0 %v1484_v22  ;;  %221 = vperm.xlu2 %1335, %v211_v24  }
 0x19e   :  { %266 = vperm.xlu1 %1333, %v211_v24   ;;  %216 = vperm.xlu0 %1332, %v208_v23  }
 0x1a3   :  { %v182_v26 = vpop.f32.mrf.mxu2 }
 0x1a4   :  { %v224_v27 = vperm.slane %v182_v26, 0  ;;  %v269_v29 = vperm.slane %v182_v26, 1  ;;  %v379_v53 = vperm.slane %v182_v26, 2 }
 0x1a5   :  { %1336 = vset.pattern.permute.xlu2 %v1485_v25 }
 0x1a6   :  { %1334 = vset.pattern.permute.xlu1 %v1485_v25  ;;  %376 = vperm.xlu2 %1336, %v211_v24  }
 0x1a7   :  { %372 = vperm.xlu1 %1334, %v208_v23   ;;  %1348 = vset.pattern.permute.xlu0 %v1485_v25 }
 0x1ae   :  { %1347 = vset.pattern.permute.xlu2 %v1484_v22 }
 0x1af   :  { %1350 = vset.pattern.permute.xlu1 %v1484_v22 }
 0x1f7   :  { %v222_v28 = vpop.permute.xlu2 %221 }
 0x1f8   :  { %v226_v30 = vadd.f32 %v224_v27, %v222_v28 }
 0x1fa   :  { %v230_v35 = vadd.f32 %v228_v31, %v226_v30 }
 0x1fc   :  { %v234_v39 = vmul.f32 0.2, %v230_v35  ;;  %vm232_vm6 = vcmp.gt.f32.partialorder %v230_v35, 0.0 }
 0x1fe   :  { %v236_v50 = vsel %vm232_vm6, %v230_v35, %v234_v39 }
 0x1ff   :  { %v238_v54 = vsel %vm78_vm7, %v236_v50, -1e+30 }
 0x200   :  { %v377_v55 = vpop.permute.xlu2 %376  ;;  %v242_v62 = vsel %vm124_vm2, %v238_v54, -inf }
 0x201   :  { %v381_v60 = vadd.f32 %v379_v53, %v377_v55 }
 0x203   :  { %v386_v6 = vadd.f32 %v1280_v0, %v381_v60 }
 0x205   :  { %v390_v10 = vmul.f32 0.2, %v386_v6  ;;  %vm388_vm11 = vcmp.gt.f32.partialorder %v386_v6, 0.0 }
 0x207   :  { %v263_v33 = vpop.permute.xlu0 %262  ;;  %v392_v13 = vsel %vm388_vm11, %v386_v6, %v390_v10  ;;  %vm1245_vm11 = vcmask 25600  }
 0x208   :  { %v270_v34 = vadd.f32 %v269_v29, %v263_v33  ;;  %v394_v14 = vsel %vm78_vm7, %v392_v13, -1e+30  ;;  %v464_v13 = vld [vmem:[%s1982_s10] sm:$0xff] }
 0x209   :  { %v398_v15 = vsel %vm124_vm2, %v394_v14, -inf }
 0x20a   :  { %v275_v37 = vadd.f32 %v1273_v32, %v270_v34 }
 0x20c   :  { %vm277_vm5 = vcmp.gt.f32.partialorder %v275_v37, 0.0  ;;  %v279_v38 = vmul.f32 0.2, %v275_v37 }
 0x20e   :  { %v281_v40 = vsel %vm277_vm5, %v275_v37, %v279_v38 }
 0x20f   :  { %v283_v42 = vsel %vm77_vm4, %v281_v40, -1e+30 }
 0x210   :  { %v267_v44 = vpop.permute.xlu1 %266  ;;  %v217_v46 = vpop.permute.xlu0 %216  ;;  %v285_v47 = vsel %vm124_vm2, %v283_v42, -inf }
 0x211   :  { %v271_v48 = vadd.f32 %v269_v29, %v267_v44  ;;  %v225_v49 = vadd.f32 %v224_v27, %v217_v46  ;;  %286 = vmax.xlane.f32.xlu1 %v285_v47 }
 0x213   :  { %v276_v51 = vadd.f32 %v1274_v43, %v271_v48  ;;  %v229_v52 = vadd.f32 %v227_v45, %v225_v49 }
 0x215   :  { %vm278_vm8 = vcmp.gt.f32.partialorder %v276_v51, 0.0  ;;  %v280_v56 = vmul.f32 0.2, %v276_v51  ;;  %vm231_vm9 = vcmp.gt.f32.partialorder %v229_v52, 0.0  ;;  %v233_v57 = vmul.f32 0.2, %v229_v52 }
 0x217   :  { %v282_v58 = vsel %vm278_vm8, %v276_v51, %v280_v56  ;;  %v235_v59 = vsel %vm231_vm9, %v229_v52, %v233_v57 }
 0x218   :  { %v284_v61 = vsel %vm78_vm7, %v282_v58, -1e+30  ;;  %v237_v63 = vsel %vm77_vm4, %v235_v59, -1e+30 }
 0x219   :  { %v373_v2 = vpop.permute.xlu1 %372  ;;  %v288_v3 = vsel %vm124_vm2, %v284_v61, -inf  ;;  %243 = vmax.xlane.f32.xlu1 %v242_v62  ;;  %v239_v4 = vsel %vm124_vm2, %v237_v63, -inf }
 0x21a   :  { %v380_v5 = vadd.f32 %v379_v53, %v373_v2  ;;  %289 = vmax.xlane.f32.xlu0 %v288_v3  ;;  %240 = vmax.xlane.f32.xlu2 %v239_v4 }
 0x21c   :  { %v385_v7 = vadd.f32 %v1279_v1, %v380_v5 }
 0x21e   :  { %vm387_vm10 = vcmp.gt.f32.partialorder %v385_v7, 0.0  ;;  %v389_v8 = vmul.f32 0.2, %v385_v7 }
 0x220   :  { %v391_v9 = vsel %vm387_vm10, %v385_v7, %v389_v8 }
 0x221   :  { %v393_v11 = vsel %vm77_vm4, %v391_v9, -1e+30 }
 0x222   :  { %v395_v12 = vsel %vm124_vm2, %v393_v11, -inf }
 0x223   :  { %396 = vmax.xlane.f32.xlu2 %v395_v12  ;;  %v465_v12 = vld [vmem:[%s1982_s10 + $0x8] sm:$0xff] }
 0x224   :  { %486 = vmatpush.msrb.mxu3 %v465_v12 }
 0x226   :  { %487 = vmatpush.msrb.mxu3 %v464_v13 }
 0x22b   :  { %399 = vmax.xlane.f32.xlu2 %v398_v15  ;;  %v529_v15 = vld [vmem:[%s1984_s12 + $0x20] sm:$0xff] }
 0x243   :  { %1338 = vrot.lane.b32.xlu2 %v1337_v16, %s1486_s25 }
 0x284   :  { %v287_v17 = vpop.xlane.xlu1 %286 }
 0x285   :  { %v291_v21 = vsub.f32 %v283_v42, %v287_v17  ;;  %v527_v17 = vld [vmem:[%s1984_s12 + $0x10] sm:$0xff] }
 0x287   :  { %v293_v23 = vmul.f32 1.442695, %v291_v21  ;;  %v526_v21 = vld [vmem:[%s1984_s12 + $0x8] sm:$0xff] }
 0x289   :  { %1385 = vpow2.f32 %v293_v23 }
 0x28c   :  { %v244_v24 = vpop.xlane.xlu1 %243 }
 0x28d   :  { %v290_v26 = vpop.xlane.xlu0 %289  ;;  %v241_v27 = vpop.xlane.xlu2 %240  ;;  %v246_v32 = vsub.f32 %v238_v54, %v244_v24 }
 0x28e   :  { %v292_v28 = vsub.f32 %v284_v61, %v290_v26  ;;  %v245_v29 = vsub.f32 %v237_v63, %v241_v27 }
 0x28f   :  { %v1386_v30 = vpop.eup %1385  ;;  %v249_v19 = vmul.f32 1.442695, %v246_v32 }
 0x290   :  { %v295_v31 = vmul.f32 1.442695, %v292_v28  ;;  %v247_v33 = vmul.f32 1.442695, %v245_v29  ;;  %v297_v34 = vsel %vm124_vm2, %v1386_v30, 0.0 }
 0x291   :  { %298 = vadd.xlane.f32.xlu0 %v297_v34  ;;  %v1380_v29 = vld [vmem:[%s1981_s9] ss:$0 sm:$0xff] }
 0x292   :  { %1387 = vpow2.f32 %v295_v31 }
 0x293   :  { %1389 = vpow2.f32 %v247_v33 }
 0x294   :  { %1391 = vpow2.f32 %v249_v19 }
 0x296   :  { %v397_v20 = vpop.xlane.xlu2 %396 }
 0x297   :  { %v401_v35 = vsub.f32 %v393_v11, %v397_v20 }
 0x298   :  { %v1388_v37 = vpop.eup %1387 }
 0x299   :  { %v1390_v38 = vpop.eup %1389  ;;  %v403_v39 = vmul.f32 1.442695, %v401_v35  ;;  %v300_v40 = vsel %vm124_vm2, %v1388_v37, 0.0 }
 0x29a   :  { %301 = vadd.xlane.f32.xlu0 %v300_v40  ;;  %v251_v42 = vsel %vm124_vm2, %v1390_v38, 0.0  ;;  %v1392_v43 = vpop.eup %1391  ;;  %v525_v40 = vld [vmem:[%s1984_s12] sm:$0xff] }
 0x29b   :  { %1393 = vpow2.f32 %v403_v39  ;;  %252 = vadd.xlane.f32.xlu1 %v251_v42  ;;  %v254_v48 = vsel %vm124_vm2, %v1392_v43, 0.0 }
 0x29e   :  { %v400_v44 = vpop.xlane.xlu2 %399 }
 0x29f   :  { %v402_v45 = vsub.f32 %v394_v14, %v400_v44  ;;  %v530_v14 = vld [vmem:[%s1984_s12 + $0x28] sm:$0xff]  ;;  %v495_v44 = vld [vmem:[%s1983_s11] sm:$0x7]  ;;  %s2016_s11 = sld [smem:[#allocation6_spill]] }
 0x2a0   :  { %541 = vmatpush.msra.mxu0 %v530_v14  ;;  %v1291_v14 = vld [vmem:[%s2014_s24 + $0x38] sm:$0xff] }
 0x2a1   :  { %v1394_v46 = vpop.eup %1393  ;;  %v405_v47 = vmul.f32 1.442695, %v402_v45 }
 0x2a2   :  { %255 = vadd.xlane.f32.xlu0 %v254_v48  ;;  %v407_v49 = vsel %vm124_vm2, %v1394_v46, 0.0  ;;  %542 = vmatpush.msra.mxu0 %v529_v15 }
 0x2a3   :  { %1395 = vpow2.f32 %v405_v47  ;;  %408 = vadd.xlane.f32.xlu1 %v407_v49  ;;  %v1290_v49 = vld [vmem:[%s2014_s24 + $0x30] sm:$0xff] }
 0x2a6   :  { %v1339_v50 = vpop.permute.xlu2 %1338 }
 0x2a7   :  { %v1340_v51 = vunpack.i.l.bf16 %v1339_v50  ;;  %v1341_v53 = vunpack.i.h.bf16 %v1339_v50 }
 0x2a9   :  { %v1396_v52 = vpop.eup %1395  ;;  %333 = vmatpush.msrb.mxu2 %v1340_v51 }
 0x2aa   :  { %v410_v54 = vsel %vm124_vm2, %v1396_v52, 0.0 }
 0x2ab   :  { %411 = vadd.xlane.f32.xlu0 %v410_v54  ;;  %334 = vmatpush.msrb.mxu2 %v1341_v53 }
 0x2bc   :  { %1343 = vrot.lane.b32.xlu1 %v1337_v16, %s1487_s5  ;;  %v528_v16 = vld [vmem:[%s1984_s12 + $0x18] sm:$0xff] }
 0x2bd   :  { %543 = vmatpush.msra.mxu0 %v528_v16 }
 0x2bf   :  { %544 = vmatpush.msra.mxu0 %v527_v17 }
 0x2c1   :  { %545 = vmatpush.msra.mxu0 %v526_v21 }
 0x2c3   :  { %546 = vmatpush.msra.mxu0 %v525_v40 }
 0x304   :  { %v299_v55 = vpop.xlane.xlu0 %298 }
 0x305   :  { %1397 = vrcp.f32 %v299_v55 }
 0x30b   :  { %v1398_v56 = vpop.eup %1397 }
 0x30c   :  { %v305_v57 = vmul.f32 %v1398_v56, %v1386_v30 }
 0x30d   :  { %v302_v58 = vpop.xlane.xlu0 %301 }
 0x30e   :  { %1399 = vrcp.f32 %v302_v58  ;;  %v253_v59 = vpop.xlane.xlu1 %252  ;;  %1275 = vmatmul.msk.f32.vlgmr.msrb.gmra.mxu2 %vm124_vm2, %v305_v57  ;;  %v1292_v57 = vld [vmem:[%s2014_s24 + $0x40] sm:$0xff] }
 0x30f   :  { %1401 = vrcp.f32 %v253_v59 }
 0x314   :  { %v1400_v60 = vpop.eup %1399 }
 0x315   :  { %v1402_v61 = vpop.eup %1401  ;;  %v256_v62 = vpop.xlane.xlu0 %255  ;;  %v306_v63 = vmul.f32 %v1400_v60, %v1388_v37 }
 0x316   :  { %1403 = vrcp.f32 %v256_v62  ;;  %v259_v0 = vmul.f32 %v1402_v61, %v1390_v38  ;;  %v409_v3 = vpop.xlane.xlu1 %408 }
 0x317   :  { %1276 = vmatmul.msk.f32.gmra.mxu2 %vm124_vm2, %v306_v63  ;;  %1405 = vrcp.f32 %v409_v3 }
 0x318   :  { %1277 = vmatmul.msk.f32.vlgmr.msrb.gmra.mxu0 %vm124_vm2, %v259_v0 }
 0x31c   :  { %v1404_v1 = vpop.eup %1403 }
 0x31d   :  { %v260_v2 = vmul.f32 %v1404_v1, %v1392_v43  ;;  %v1406_v6 = vpop.eup %1405 }
 0x31e   :  { %v412_v4 = vpop.xlane.xlu0 %411  ;;  %v415_v9 = vmul.f32 %v1406_v6, %v1394_v46  ;;  %v1298_v6 = vld [vmem:[%s2014_s24 + $0x50] sm:$0xff] }
 0x31f   :  { %1407 = vrcp.f32 %v412_v4 }
 0x320   :  { %1278 = vmatmul.msk.f32.gmra.mxu0 %vm124_vm2, %v260_v2 }
 0x325   :  { %v1408_v10 = vpop.eup %1407 }
 0x326   :  { %v416_v11 = vmul.f32 %v1408_v10, %v1396_v52 }
 0x32e   :  { %v1344_v5 = vpop.permute.xlu1 %1343 }
 0x32f   :  { %v1345_v7 = vunpack.i.l.bf16 %v1344_v5  ;;  %v1346_v8 = vunpack.i.h.bf16 %v1344_v5  ;;  %v1299_v5 = vld [vmem:[%s2014_s24 + $0x58] sm:$0xff] }
 0x331   :  { %443 = vmatpush.msrb.mxu1 %v1345_v7 }
 0x333   :  { %444 = vmatpush.msrb.mxu1 %v1346_v8 }
 0x334   :  { %1281 = vmatmul.msk.f32.vlgmr.msrb.gmra.mxu1 %vm124_vm2, %v415_v9 }
 0x33c   :  { %1282 = vmatmul.msk.f32.gmra.mxu1 %vm124_vm2, %v416_v11 }
 0x391   :  { %v336_v24 = vpop.f32.mrf.mxu2 }
 0x395   :  { %v365_v23 = vpop.f32.mrf.mxu0 }
 0x396   :  { %v366_v26 = vadd.f32 %v365_v23, %v336_v24 }
 0x39a   :  { %v339_v33 = vpop.f32.mrf.mxu2 }
 0x39d   :  { %v368_v31 = vpop.f32.mrf.mxu0 }
 0x39e   :  { %v369_v34 = vadd.f32 %v368_v31, %v339_v33 }
 0x3b1   :  { %v446_v27 = vpop.f32.mrf.mxu1 }
 0x3b2   :  { %v452_v28 = vadd.f32 %v446_v27, %v366_v26 }
 0x3b4   :  { %v454_v30 = vmul.f32 0.33333334, %v452_v28 }
 0x3b6   :  { %v460_v32 = vadd.f32 %v1380_v29, %v454_v30  ;;  %v1293_v30 = vld [vmem:[%s2014_s24 + $0x48] sm:$0xff] }
 0x3b8   :  { %v462_v19 = vmax.f32 %v460_v32, 0.0 }
 0x3b9   :  { %v449_v20 = vpop.f32.mrf.mxu1 }
 0x3ba   :  { %v453_v35 = vadd.f32 %v449_v20, %v369_v34  ;;  %1283 = vmatmul.msk.f32.vlgmr.msrb.gmra.mxu3 %vm124_vm2, %v462_v19 }
 0x3bc   :  { %v455_v37 = vmul.f32 0.33333334, %v453_v35 }
 0x3be   :  { %v461_v38 = vadd.f32 %v1380_v29, %v455_v37 }
 0x3c0   :  { %v463_v39 = vmax.f32 %v461_v38, 0.0 }
 0x3c2   :  { %1284 = vmatmul.msk.f32.gmra.mxu3 %vm124_vm2, %v463_v39 }
 0x43d   :  { %v1768_v42 = vpop.f32.mrf.mxu3 }
 0x43e   :  { %1288 = vmatmul.msk.f32.vlgmr.msra.gmra.mxu0 %vm155_vm3, %v1768_v42 }
 0x445   :  { %v1772_v43 = vpop.f32.mrf.mxu3 }
 0x446   :  { %1285 = vmatpush.xpose.msk.msra.mxu2 %vm155_vm3, %v1772_v43  ;;  %1289 = vmatmul.msk.f32.gmra.mxu0 %vm155_vm3, %v1772_v43 }
 0x44a   :  { %1286 = vmatpush.xpose.msk.msra.mxu2 %vm155_vm3, %v1768_v42 }
 0x44d   :  { %1287 = vmatmul.msk.f32.vlgmr.msra.gmra.mxu2 %vm155_vm3, %v495_v44  ;;  %vm837_vm3 = vcmask 195584  }
 0x44e   :  { %703 = vmatpush.msrb.mxu2 %v1772_v43 }
 0x450   :  { %704 = vmatpush.msrb.mxu2 %v1768_v42 }
 0x4bb   :  { %v548_v45 = vpop.f32.mrf.mxu0 }
 0x4bc   :  { %713 = vperm.xlu0 %1348, %v548_v45   ;;  %556 = vperm.xlu2 %1347, %v548_v45  }
 0x4c3   :  { %v551_v46 = vpop.f32.mrf.mxu0 }
 0x4c4   :  { %1349 = vset.pattern.permute.xlu2 %v1483_v18  ;;  %561 = vperm.xlu1 %1350, %v551_v46  }
 0x4c5   :  { %603 = vperm.xlu2 %1349, %v548_v45   ;;  %1363 = vset.pattern.permute.xlu0 %v1484_v22 }
 0x4cc   :  { %1352 = vset.pattern.permute.xlu1 %v1483_v18 }
 0x4cd   :  { %1351 = vset.pattern.permute.xlu2 %v1485_v25  ;;  %607 = vperm.xlu1 %1352, %v551_v46  }
 0x4ce   :  { %717 = vperm.xlu2 %1351, %v551_v46  }
 0x4d0   :  { %v522_v47 = vpop.f32.mrf.mxu2 }
 0x4d1   :  { %v564_v48 = vperm.slane %v522_v47, 0  ;;  %v610_v54 = vperm.slane %v522_v47, 1  ;;  %v720_v2 = vperm.slane %v522_v47, 2 }
 0x4d5   :  { %1366 = vset.pattern.permute.xlu1 %v1484_v22 }
 0x4d6   :  { %1364 = vset.pattern.permute.xlu2 %v1483_v18 }
 0x516   :  { %v557_v50 = vpop.permute.xlu2 %556 }
 0x517   :  { %v565_v51 = vadd.f32 %v564_v48, %v557_v50 }
 0x519   :  { %v570_v52 = vadd.f32 %v1290_v49, %v565_v51 }
 0x51b   :  { %vm572_vm12 = vcmp.gt.f32.partialorder %v570_v52, 0.0  ;;  %v574_v53 = vmul.f32 0.2, %v570_v52 }
 0x51d   :  { %v576_v55 = vsel %vm572_vm12, %v570_v52, %v574_v53 }
 0x51e   :  { %v578_v56 = vsel %vm77_vm4, %v576_v55, -1e+30 }
 0x51f   :  { %v604_v58 = vpop.permute.xlu2 %603  ;;  %v580_v59 = vsel %vm124_vm2, %v578_v56, -inf }
 0x520   :  { %v611_v60 = vadd.f32 %v610_v54, %v604_v58  ;;  %581 = vmax.xlane.f32.xlu2 %v580_v59 }
 0x522   :  { %v616_v61 = vadd.f32 %v1292_v57, %v611_v60 }
 0x524   :  { %vm618_vm13 = vcmp.gt.f32.partialorder %v616_v61, 0.0  ;;  %v620_v62 = vmul.f32 0.2, %v616_v61 }
 0x526   :  { %v622_v63 = vsel %vm618_vm13, %v616_v61, %v620_v62 }
 0x527   :  { %v624_v0 = vsel %vm77_vm4, %v622_v63, -1e+30 }
 0x528   :  { %v626_v1 = vsel %vm124_vm2, %v624_v0, -inf  ;;  %v718_v3 = vpop.permute.xlu2 %717 }
 0x529   :  { %627 = vmax.xlane.f32.xlu0 %v626_v1  ;;  %v722_v4 = vadd.f32 %v720_v2, %v718_v3 }
 0x52b   :  { %v727_v9 = vadd.f32 %v1299_v5, %v722_v4 }
 0x52d   :  { %v731_v13 = vmul.f32 0.2, %v727_v9  ;;  %vm729_vm15 = vcmp.gt.f32.partialorder %v727_v9, 0.0 }
 0x52e   :  { %v714_v7 = vpop.permute.xlu0 %713 }
 0x52f   :  { %v721_v8 = vadd.f32 %v720_v2, %v714_v7  ;;  %v733_v24 = vsel %vm729_vm15, %v727_v9, %v731_v13 }
 0x530   :  { %v735_v27 = vsel %vm78_vm7, %v733_v24, -1e+30 }
 0x531   :  { %v726_v10 = vadd.f32 %v1298_v6, %v721_v8  ;;  %v739_v32 = vsel %vm124_vm2, %v735_v27, -inf  ;;  %v1353_v8 = vpack.i.bf16 %v1768_v42, %v1772_v43 }
 0x533   :  { %vm728_vm14 = vcmp.gt.f32.partialorder %v726_v10, 0.0  ;;  %v730_v11 = vmul.f32 0.2, %v726_v10 }
 0x535   :  { %v732_v12 = vsel %vm728_vm14, %v726_v10, %v730_v11 }
 0x536   :  { %v562_v15 = vpop.permute.xlu1 %561  ;;  %v734_v16 = vsel %vm77_vm4, %v732_v12, -1e+30 }
 0x537   :  { %v566_v17 = vadd.f32 %v564_v48, %v562_v15  ;;  %v736_v21 = vsel %vm124_vm2, %v734_v16, -inf }
 0x538   :  { %737 = vmax.xlane.f32.xlu1 %v736_v21 }
 0x539   :  { %v571_v23 = vadd.f32 %v1291_v14, %v566_v17 }
 0x53b   :  { %vm573_vm0 = vcmp.gt.f32.partialorder %v571_v23, 0.0  ;;  %v575_v26 = vmul.f32 0.2, %v571_v23 }
 0x53d   :  { %v577_v28 = vsel %vm573_vm0, %v571_v23, %v575_v26 }
 0x53e   :  { %v579_v29 = vsel %vm78_vm7, %v577_v28, -1e+30 }
 0x53f   :  { %v608_v31 = vpop.permute.xlu1 %607  ;;  %v583_v33 = vsel %vm124_vm2, %v579_v29, -inf }
 0x540   :  { %v612_v34 = vadd.f32 %v610_v54, %v608_v31  ;;  %740 = vmax.xlane.f32.xlu1 %v739_v32  ;;  %584 = vmax.xlane.f32.xlu2 %v583_v33 }
 0x542   :  { %v617_v19 = vadd.f32 %v1293_v30, %v612_v34 }
 0x544   :  { %vm619_vm1 = vcmp.gt.f32.partialorder %v617_v19, 0.0  ;;  %v621_v20 = vmul.f32 0.2, %v617_v19 }
 0x546   :  { %v623_v35 = vsel %vm619_vm1, %v617_v19, %v621_v20  ;;  %v806_v20 = vld [vmem:[%s1986_s14 + $0x8] sm:$0xff] }
 0x547   :  { %v625_v37 = vsel %vm78_vm7, %v623_v35, -1e+30  ;;  %827 = vmatpush.msrb.mxu0 %v806_v20  ;;  %v805_v35 = vld [vmem:[%s1986_s14] sm:$0xff] }
 0x548   :  { %v629_v38 = vsel %vm124_vm2, %v625_v37, -inf }
 0x549   :  { %630 = vmax.xlane.f32.xlu2 %v629_v38  ;;  %828 = vmatpush.msrb.mxu0 %v805_v35  ;;  %v868_v38 = vld [vmem:[%s1988_s16 + $0x8] sm:$0xff] }
 0x593   :  { %v582_v39 = vpop.xlane.xlu2 %581 }
 0x594   :  { %v586_v40 = vsub.f32 %v578_v56, %v582_v39 }
 0x596   :  { %v588_v44 = vmul.f32 1.442695, %v586_v40 }
 0x598   :  { %1409 = vpow2.f32 %v588_v44 }
 0x59c   :  { %v628_v45 = vpop.xlane.xlu0 %627 }
 0x59d   :  { %v632_v46 = vsub.f32 %v624_v0, %v628_v45 }
 0x59e   :  { %v1410_v47 = vpop.eup %1409 }
 0x59f   :  { %v634_v48 = vmul.f32 1.442695, %v632_v46  ;;  %v592_v49 = vsel %vm124_vm2, %v1410_v47, 0.0 }
 0x5a0   :  { %593 = vadd.xlane.f32.xlu1 %v592_v49 }
 0x5a1   :  { %1411 = vpow2.f32 %v634_v48 }
 0x5a7   :  { %v1829_v50 = vpop.eup %1411 }
 0x5a8   :  { %v638_v51 = vsel %vm124_vm2, %v1829_v50, 0.0 }
 0x5a9   :  { %639 = vadd.xlane.f32.xlu0 %v638_v51 }
 0x5ab   :  { %v738_v52 = vpop.xlane.xlu1 %737 }
 0x5ac   :  { %v742_v53 = vsub.f32 %v734_v16, %v738_v52 }
 0x5ae   :  { %v744_v54 = vmul.f32 1.442695, %v742_v53 }
 0x5b0   :  { %1413 = vpow2.f32 %v744_v54 }
 0x5b3   :  { %v741_v55 = vpop.xlane.xlu1 %740  ;;  %v585_v56 = vpop.xlane.xlu2 %584 }
 0x5b4   :  { %v743_v57 = vsub.f32 %v735_v27, %v741_v55  ;;  %v587_v58 = vsub.f32 %v579_v29, %v585_v56 }
 0x5b6   :  { %v1414_v59 = vpop.eup %1413  ;;  %v746_v60 = vmul.f32 1.442695, %v743_v57  ;;  %v590_v61 = vmul.f32 1.442695, %v587_v58 }
 0x5b7   :  { %v748_v62 = vsel %vm124_vm2, %v1414_v59, 0.0 }
 0x5b8   :  { %1415 = vpow2.f32 %v746_v60  ;;  %749 = vadd.xlane.f32.xlu2 %v748_v62  ;;  %v836_v62 = vld [vmem:[%s1987_s15] sm:$0x7] }
 0x5b9   :  { %1417 = vpow2.f32 %v590_v61 }
 0x5bc   :  { %v631_v63 = vpop.xlane.xlu2 %630 }
 0x5bd   :  { %v633_v0 = vsub.f32 %v625_v37, %v631_v63  ;;  %v869_v37 = vld [vmem:[%s1988_s16 + $0x10] sm:$0xff] }
 0x5be   :  { %v1416_v1 = vpop.eup %1415  ;;  %883 = vmatpush.msra.mxu2 %v869_v37 }
 0x5bf   :  { %v1418_v2 = vpop.eup %1417  ;;  %v636_v3 = vmul.f32 1.442695, %v633_v0  ;;  %v751_v4 = vsel %vm124_vm2, %v1416_v1, 0.0 }
 0x5c0   :  { %752 = vadd.xlane.f32.xlu0 %v751_v4  ;;  %v595_v5 = vsel %vm124_vm2, %v1418_v2, 0.0  ;;  %884 = vmatpush.msra.mxu2 %v868_v38 }
 0x5c1   :  { %1419 = vpow2.f32 %v636_v3  ;;  %596 = vadd.xlane.f32.xlu1 %v595_v5  ;;  %v1311_v3 = vld [vmem:[%s2014_s24 + $0x70] sm:$0xff] }
 0x5c7   :  { %v1420_v6 = vpop.eup %1419 }
 0x5c8   :  { %v641_v7 = vsel %vm124_vm2, %v1420_v6, 0.0 }
 0x5c9   :  { %642 = vadd.xlane.f32.xlu0 %v641_v7 }
 0x5d0   :  { %1354 = vrot.lane.b32.xlu2 %v1353_v8, %s1487_s5 }
 0x5da   :  { %1359 = vrot.lane.b32.xlu1 %v1353_v8, %s1486_s25 }
 0x613   :  { %v594_v9 = vpop.xlane.xlu1 %593 }
 0x614   :  { %1421 = vrcp.f32 %v594_v9 }
 0x61a   :  { %v1422_v10 = vpop.eup %1421 }
 0x61b   :  { %v600_v11 = vmul.f32 %v1422_v10, %v1410_v47  ;;  %v1381_v47 = vld [vmem:[%s1985_s13] ss:$0 sm:$0xff] }
 0x61c   :  { %v640_v12 = vpop.xlane.xlu0 %639 }
 0x61d   :  { %1296 = vmatmul.msk.f32.vlgmr.msrb.gmra.mxu2 %vm124_vm2, %v600_v11 }
 0x62b   :  { %v750_v13 = vpop.xlane.xlu2 %749 }
 0x62c   :  { %1423 = vrcp.f32 %v750_v13  ;;  %v1309_v13 = vld [vmem:[%s2014_s24 + $0x60] sm:$0xff] }
 0x632   :  { %v1424_v16 = vpop.eup %1423 }
 0x633   :  { %v753_v14 = vpop.xlane.xlu0 %752  ;;  %v1355_v15 = vpop.permute.xlu2 %1354  ;;  %v756_v43 = vmul.f32 %v1424_v16, %v1414_v59  ;;  %v867_v59 = vld [vmem:[%s1988_s16] sm:$0xff] }
 0x634   :  { %v597_v17 = vpop.xlane.xlu1 %596  ;;  %v1356_v21 = vunpack.i.l.bf16 %v1355_v15  ;;  %v1357_v42 = vunpack.i.h.bf16 %v1355_v15  ;;  %885 = vmatpush.msra.mxu2 %v867_v59 }
 0x635   :  { %1425 = vrcp.f32 %v597_v17 }
 0x636   :  { %1427 = vrcp.f32 %v753_v14  ;;  %784 = vmatpush.msra.mxu3 %v1356_v21 }
 0x637   :  { %1429 = vrcp.f32 %v640_v12  ;;  %v1317_v12 = vld [vmem:[%s2014_s24 + $0x80] sm:$0xff] }
 0x638   :  { %785 = vmatpush.msra.mxu3 %v1357_v42 }
 0x639   :  { %1300 = vmatmul.msk.f32.vlgmr.msra.gmra.mxu3 %vm124_vm2, %v756_v43 }
 0x63b   :  { %v1426_v23 = vpop.eup %1425 }
 0x63c   :  { %v1428_v24 = vpop.eup %1427  ;;  %v601_v26 = vmul.f32 %v1426_v23, %v1418_v2  ;;  %v643_v28 = vpop.xlane.xlu0 %642 }
 0x63d   :  { %v757_v27 = vmul.f32 %v1428_v24, %v1416_v1  ;;  %v1430_v30 = vpop.eup %1429  ;;  %1431 = vrcp.f32 %v643_v28 }
 0x63e   :  { %1297 = vmatmul.msk.f32.gmra.mxu2 %vm124_vm2, %v601_v26  ;;  %v646_v33 = vmul.f32 %v1430_v30, %v1829_v50  ;;  %v1318_v26 = vld [vmem:[%s2014_s24 + $0x88] sm:$0xff] }
 0x641   :  { %1301 = vmatmul.msk.f32.gmra.mxu3 %vm124_vm2, %v757_v27  ;;  %v1310_v27 = vld [vmem:[%s2014_s24 + $0x68] sm:$0xff] }
 0x643   :  { %v1432_v34 = vpop.eup %1431 }
 0x644   :  { %v647_v19 = vmul.f32 %v1432_v34, %v1420_v6 }
 0x64c   :  { %v1360_v29 = vpop.permute.xlu1 %1359 }
 0x64d   :  { %v1361_v31 = vunpack.i.l.bf16 %v1360_v29  ;;  %v1362_v32 = vunpack.i.h.bf16 %v1360_v29 }
 0x64f   :  { %674 = vmatpush.msra.mxu1 %v1361_v31 }
 0x651   :  { %675 = vmatpush.msra.mxu1 %v1362_v32 }
 0x652   :  { %1294 = vmatmul.msk.f32.vlgmr.msra.gmra.mxu1 %vm124_vm2, %v646_v33 }
 0x65a   :  { %1295 = vmatmul.msk.f32.gmra.mxu1 %vm124_vm2, %v647_v19 }
 0x6a0   :  { %v706_v39 = vpop.f32.mrf.mxu2 }
 0x6bc   :  { %v787_v40 = vpop.f32.mrf.mxu3 }
 0x6c1   :  { %v709_v50 = vpop.f32.mrf.mxu2 }
 0x6c4   :  { %v790_v54 = vpop.f32.mrf.mxu3 }
 0x6cf   :  { %v677_v44 = vpop.f32.mrf.mxu1 }
 0x6d0   :  { %v707_v45 = vadd.f32 %v706_v39, %v677_v44  ;;  %v1312_v39 = vld [vmem:[%s2014_s24 + $0x78] sm:$0xff]  ;;  %s1488_s24 = smov 120  }
 0x6d2   :  { %v793_v46 = vadd.f32 %v787_v40, %v707_v45 }
 0x6d4   :  { %v795_v48 = vmul.f32 0.33333334, %v793_v46 }
 0x6d6   :  { %v801_v49 = vadd.f32 %v1381_v47, %v795_v48 }
 0x6d7   :  { %v680_v51 = vpop.f32.mrf.mxu1 }
 0x6d8   :  { %v803_v52 = vmax.f32 %v801_v49, 0.0  ;;  %v710_v53 = vadd.f32 %v709_v50, %v680_v51 }
 0x6da   :  { %v794_v55 = vadd.f32 %v790_v54, %v710_v53  ;;  %1302 = vmatmul.msk.f32.vlgmr.msrb.gmra.mxu0 %vm124_vm2, %v803_v52 }
 0x6dc   :  { %v796_v56 = vmul.f32 0.33333334, %v794_v55 }
 0x6de   :  { %v802_v57 = vadd.f32 %v1381_v47, %v796_v56 }
 0x6e0   :  { %v804_v58 = vmax.f32 %v802_v57, 0.0 }
 0x6e2   :  { %1303 = vmatmul.msk.f32.gmra.mxu0 %vm124_vm2, %v804_v58 }
 0x757   :  { %v1868_v60 = vpop.f32.mrf.mxu0 }
 0x758   :  { %1307 = vmatmul.msk.f32.vlgmr.msra.gmra.mxu2 %vm837_vm3, %v1868_v60 }
 0x75f   :  { %v1871_v61 = vpop.f32.mrf.mxu0 }
 0x760   :  { %1304 = vmatpush.xpose.msk.msrb.mxu1 %vm837_vm3, %v1871_v61  ;;  %1308 = vmatmul.msk.f32.gmra.mxu2 %vm837_vm3, %v1871_v61  ;;  %v1368_v41 = vpack.i.bf16 %v1868_v60, %v1871_v61 }
 0x761   :  { %1042 = vmatpush.msrb.mxu3 %v1871_v61 }
 0x763   :  { %1043 = vmatpush.msrb.mxu3 %v1868_v60 }
 0x764   :  { %1305 = vmatpush.xpose.msk.msrb.mxu1 %vm837_vm3, %v1868_v60 }
 0x767   :  { %1306 = vmatmul.msk.f32.vlgmr.msrb.gmra.mxu1 %vm837_vm3, %v836_v62 }
 0x7db   :  { %v887_v63 = vpop.f32.mrf.mxu2 }
 0x7dc   :  { %942 = vperm.xlu2 %1364, %v887_v63   ;;  %895 = vperm.xlu0 %1363, %v887_v63  }
 0x7e3   :  { %v890_v0 = vpop.f32.mrf.mxu2 }
 0x7e4   :  { %1365 = vset.pattern.permute.xlu2 %v1485_v25  ;;  %900 = vperm.xlu1 %1366, %v890_v0   ;;  %v864_v1 = vpop.f32.mrf.mxu1 }
 0x7e5   :  { %1052 = vperm.xlu2 %1365, %v887_v63   ;;  %v949_v2 = vperm.slane %v864_v1, 1  ;;  %v903_v10 = vperm.slane %v864_v1, 0 }
 0x7ec   :  { %1367 = vset.pattern.permute.xlu1 %v1483_v18 }
 0x7ed   :  { %1056 = vperm.xlu2 %1365, %v890_v0   ;;  %946 = vperm.xlu1 %1367, %v890_v0  }
 0x7f5   :  { %1378 = vset.pattern.permute.xlu1 %v1484_v22  ;;  %v1059_v22 = vperm.slane %v864_v1, 2 }
 0x836   :  { %v943_v4 = vpop.permute.xlu2 %942 }
 0x837   :  { %v950_v5 = vadd.f32 %v949_v2, %v943_v4 }
 0x839   :  { %v955_v6 = vadd.f32 %v1311_v3, %v950_v5 }
 0x83b   :  { %vm957_vm5 = vcmp.gt.f32.partialorder %v955_v6, 0.0  ;;  %v959_v7 = vmul.f32 0.2, %v955_v6 }
 0x83d   :  { %v961_v25 = vsel %vm957_vm5, %v955_v6, %v959_v7 }
 0x83e   :  { %v963_v8 = vsel %vm77_vm4, %v961_v25, -1e+30  ;;  %v1144_v25 = vld [vmem:[%s2016_s11] sm:$0xff] }
 0x83f   :  { %v965_v18 = vsel %vm124_vm2, %v963_v8, -inf  ;;  %v1053_v9 = vpop.permute.xlu2 %1052 }
 0x840   :  { %966 = vmax.xlane.f32.xlu2 %v965_v18  ;;  %v1060_v11 = vadd.f32 %v1059_v22, %v1053_v9 }
 0x842   :  { %v1065_v16 = vadd.f32 %v1317_v12, %v1060_v11 }
 0x844   :  { %v1069_v24 = vmul.f32 0.2, %v1065_v16  ;;  %vm1067_vm8 = vcmp.gt.f32.partialorder %v1065_v16, 0.0 }
 0x846   :  { %v1071_v34 = vsel %vm1067_vm8, %v1065_v16, %v1069_v24 }
 0x847   :  { %v1057_v21 = vpop.permute.xlu2 %1056  ;;  %v1073_v20 = vsel %vm77_vm4, %v1071_v34, -1e+30 }
 0x848   :  { %v1061_v43 = vadd.f32 %v1059_v22, %v1057_v21  ;;  %v1075_v45 = vsel %vm124_vm2, %v1073_v20, -inf }
 0x84a   :  { %v1066_v32 = vadd.f32 %v1318_v26, %v1061_v43 }
 0x84c   :  { %v1070_v37 = vmul.f32 0.2, %v1066_v32  ;;  %vm1068_vm10 = vcmp.gt.f32.partialorder %v1066_v32, 0.0 }
 0x84e   :  { %v896_v14 = vpop.permute.xlu0 %895  ;;  %v1072_v36 = vsel %vm1068_vm10, %v1066_v32, %v1070_v37 }
 0x84f   :  { %v904_v15 = vadd.f32 %v903_v10, %v896_v14  ;;  %v1074_v48 = vsel %vm78_vm7, %v1072_v36, -1e+30 }
 0x850   :  { %v1078_v51 = vsel %vm124_vm2, %v1074_v48, -inf }
 0x851   :  { %v909_v17 = vadd.f32 %v1309_v13, %v904_v15 }
 0x853   :  { %vm911_vm6 = vcmp.gt.f32.partialorder %v909_v17, 0.0  ;;  %v913_v42 = vmul.f32 0.2, %v909_v17 }
 0x855   :  { %v915_v23 = vsel %vm911_vm6, %v909_v17, %v913_v42 }
 0x856   :  { %v901_v28 = vpop.permute.xlu1 %900  ;;  %v917_v29 = vsel %vm77_vm4, %v915_v23, -1e+30 }
 0x857   :  { %v905_v30 = vadd.f32 %v903_v10, %v901_v28  ;;  %v919_v31 = vsel %vm124_vm2, %v917_v29, -inf  ;;  %v1145_v28 = vld [vmem:[%s2016_s11 + $0x8] sm:$0xff] }
 0x858   :  { %920 = vmax.xlane.f32.xlu1 %v919_v31 }
 0x859   :  { %v910_v33 = vadd.f32 %v1310_v27, %v905_v30 }
 0x85b   :  { %vm912_vm9 = vcmp.gt.f32.partialorder %v910_v33, 0.0  ;;  %v914_v19 = vmul.f32 0.2, %v910_v33 }
 0x85d   :  { %v916_v35 = vsel %vm912_vm9, %v910_v33, %v914_v19 }
 0x85e   :  { %v918_v38 = vsel %vm78_vm7, %v916_v35, -1e+30 }
 0x85f   :  { %v947_v40 = vpop.permute.xlu1 %946  ;;  %v922_v44 = vsel %vm124_vm2, %v918_v38, -inf }
 0x860   :  { %v951_v46 = vadd.f32 %v949_v2, %v947_v40  ;;  %923 = vmax.xlane.f32.xlu0 %v922_v44  ;;  %1076 = vmax.xlane.f32.xlu1 %v1075_v45 }
 0x862   :  { %v956_v47 = vadd.f32 %v1312_v39, %v951_v46 }
 0x864   :  { %vm958_vm4 = vcmp.gt.f32.partialorder %v956_v47, 0.0  ;;  %v960_v49 = vmul.f32 0.2, %v956_v47 }
 0x866   :  { %v962_v50 = vsel %vm958_vm4, %v956_v47, %v960_v49  ;;  %v1182_v47 = vld [vmem:[%s1991_s19] sm:$0xff] }
 0x867   :  { %v964_v52 = vsel %vm78_vm7, %v962_v50, -1e+30  ;;  %vm1187_vm7 = vcmask 64512  }
 0x868   :  { %1079 = vmax.xlane.f32.xlu1 %v1078_v51  ;;  %v968_v53 = vsel %vm124_vm2, %v964_v52, -inf }
 0x869   :  { %969 = vmax.xlane.f32.xlu2 %v968_v53 }
 0x8b3   :  { %v967_v54 = vpop.xlane.xlu2 %966 }
 0x8b4   :  { %v971_v55 = vsub.f32 %v963_v8, %v967_v54 }
 0x8b6   :  { %v973_v56 = vmul.f32 1.442695, %v971_v55 }
 0x8b8   :  { %1433 = vpow2.f32 %v973_v56  ;;  %v1382_v56 = vld [vmem:[%s1989_s17] ss:$0 sm:$0xff] }
 0x8be   :  { %v1434_v57 = vpop.eup %1433 }
 0x8bf   :  { %v977_v58 = vsel %vm124_vm2, %v1434_v57, 0.0 }
 0x8c0   :  { %978 = vadd.xlane.f32.xlu0 %v977_v58 }
 0x8cb   :  { %v921_v59 = vpop.xlane.xlu1 %920 }
 0x8cc   :  { %v925_v62 = vsub.f32 %v917_v29, %v921_v59 }
 0x8ce   :  { %v927_v63 = vmul.f32 1.442695, %v925_v62 }
 0x8d0   :  { %1435 = vpow2.f32 %v927_v63 }
 0x8d3   :  { %v924_v0 = vpop.xlane.xlu0 %923  ;;  %v1077_v1 = vpop.xlane.xlu1 %1076 }
 0x8d4   :  { %v926_v2 = vsub.f32 %v918_v38, %v924_v0  ;;  %v1081_v3 = vsub.f32 %v1073_v20, %v1077_v1  ;;  %1369 = vrot.lane.b32.xlu0 %v1368_v41, %s1488_s24 }
 0x8d6   :  { %v1436_v4 = vpop.eup %1435  ;;  %v929_v5 = vmul.f32 1.442695, %v926_v2  ;;  %v1083_v6 = vmul.f32 1.442695, %v1081_v3 }
 0x8d7   :  { %v931_v7 = vsel %vm124_vm2, %v1436_v4, 0.0 }
 0x8d8   :  { %1437 = vpow2.f32 %v929_v5  ;;  %932 = vadd.xlane.f32.xlu2 %v931_v7  ;;  %v1215_v7 = vld [vmem:[%s1993_s21 + $0x18] sm:$0xff] }
 0x8d9   :  { %1439 = vpow2.f32 %v1083_v6  ;;  %v1158_v6 = vld [vmem:[%s1990_s18] sm:$0x3]  ;;  %1236 = vmatpush.msra.mxu3 %v1215_v7 }
 0x8db   :  { %v1080_v8 = vpop.xlane.xlu1 %1079 }
 0x8dc   :  { %v970_v60 = vpop.xlane.xlu2 %969  ;;  %1148 = vperm.xlu0 %1363, %v1144_v25   ;;  %v1082_v22 = vsub.f32 %v1074_v48, %v1080_v8  ;;  %v1214_v25 = vld [vmem:[%s1993_s21 + $0x10] sm:$0xff]  ;;  %v1213_v8 = vld [vmem:[%s1993_s21 + $0x8] sm:$0xff] }
 0x8dd   :  { %v972_v61 = vsub.f32 %v964_v52, %v970_v60  ;;  %1237 = vmatpush.msra.mxu3 %v1214_v25 }
 0x8de   :  { %v1438_v18 = vpop.eup %1437  ;;  %v1085_v13 = vmul.f32 1.442695, %v1082_v22 }
 0x8df   :  { %v1440_v9 = vpop.eup %1439  ;;  %v975_v10 = vmul.f32 1.442695, %v972_v61  ;;  %v934_v11 = vsel %vm124_vm2, %v1438_v18, 0.0  ;;  %1238 = vmatpush.msra.mxu3 %v1213_v8  ;;  %v1212_v61 = vld [vmem:[%s1993_s21] sm:$0xff]  ;;  %s1254_s21 = sshll.u32 %s1995_s23, 4  ;;  %s1255_s21 = int_to_ptr.hbm [resolvable:$true] %s1254_s21 }
 0x8e0   :  { %935 = vadd.xlane.f32.xlu1 %v934_v11  ;;  %v1087_v12 = vsel %vm124_vm2, %v1440_v9, 0.0  ;;  %v1384_v11 = vld [vmem:[%s1994_s22] ss:$0 sm:$0xff] }
 0x8e1   :  { %1441 = vpow2.f32 %v975_v10  ;;  %1088 = vadd.xlane.f32.xlu2 %v1087_v12  ;;  %1239 = vmatpush.msra.mxu3 %v1212_v61 }
 0x8e2   :  { %1443 = vpow2.f32 %v1085_v13 }
 0x8e7   :  { %v1442_v14 = vpop.eup %1441 }
 0x8e8   :  { %v980_v15 = vsel %vm124_vm2, %v1442_v14, 0.0  ;;  %v1444_v16 = vpop.eup %1443 }
 0x8e9   :  { %981 = vadd.xlane.f32.xlu1 %v980_v15  ;;  %v1090_v17 = vsel %vm124_vm2, %v1444_v16, 0.0 }
 0x8f1   :  { %1091 = vadd.xlane.f32.xlu1 %v1090_v17 }
 0x8f9   :  { %1374 = vrot.lane.b32.xlu2 %v1368_v41, %s1486_s25 }
 0x90a   :  { %1153 = vperm.xlu1 %1378, %v1145_v28  }
 0x933   :  { %v979_v21 = vpop.xlane.xlu0 %978 }
 0x934   :  { %1445 = vrcp.f32 %v979_v21 }
 0x93a   :  { %v1446_v43 = vpop.eup %1445 }
 0x93b   :  { %v985_v26 = vmul.f32 %v1446_v43, %v1434_v57 }
 0x946   :  { %v1370_v42 = vpop.permute.xlu0 %1369 }
 0x947   :  { %v1371_v23 = vunpack.i.l.bf16 %v1370_v42  ;;  %v1372_v24 = vunpack.i.h.bf16 %v1370_v42 }
 0x949   :  { %1013 = vmatpush.msra.mxu1 %v1371_v23 }
 0x94b   :  { %1014 = vmatpush.msra.mxu1 %v1372_v24  ;;  %v933_v27 = vpop.xlane.xlu2 %932 }
 0x94c   :  { %1447 = vrcp.f32 %v933_v27  ;;  %1313 = vmatmul.msk.f32.vlgmr.msra.gmra.mxu1 %vm124_vm2, %v985_v26 }
 0x94d   :  { %1206 = vmatpush.msrb.mxu1 %v1182_v47 }
 0x952   :  { %v1448_v29 = vpop.eup %1447 }
 0x953   :  { %v939_v30 = vmul.f32 %v1448_v29, %v1436_v4  ;;  %v936_v31 = vpop.xlane.xlu1 %935  ;;  %v1149_v4 = vpop.permute.xlu0 %1148 }
 0x954   :  { %v1089_v32 = vpop.xlane.xlu2 %1088  ;;  %1449 = vrcp.f32 %v936_v31 }
 0x955   :  { %1315 = vmatmul.msk.f32.vlgmr.msrb.gmra.mxu3 %vm124_vm2, %v939_v30  ;;  %1451 = vrcp.f32 %v1089_v32 }
 0x95a   :  { %v1450_v33 = vpop.eup %1449 }
 0x95b   :  { %v940_v34 = vmul.f32 %v1450_v33, %v1438_v18  ;;  %v1452_v35 = vpop.eup %1451  ;;  %v1383_v18 = vld [vmem:[%s1992_s20] ss:$0 sm:$0xff] }
 0x95c   :  { %v1375_v19 = vpop.permute.xlu2 %1374  ;;  %v982_v20 = vpop.xlane.xlu1 %981  ;;  %v1095_v39 = vmul.f32 %v1452_v35, %v1440_v9 }
 0x95d   :  { %v1376_v37 = vunpack.i.l.bf16 %v1375_v19  ;;  %1453 = vrcp.f32 %v982_v20  ;;  %1316 = vmatmul.msk.f32.gmra.mxu3 %vm124_vm2, %v940_v34  ;;  %v1377_v38 = vunpack.i.h.bf16 %v1375_v19 }
 0x95f   :  { %1123 = vmatpush.msra.mxu0 %v1376_v37 }
 0x961   :  { %1124 = vmatpush.msra.mxu0 %v1377_v38 }
 0x962   :  { %1319 = vmatmul.msk.f32.vlgmr.msra.gmra.mxu0 %vm124_vm2, %v1095_v39 }
 0x963   :  { %v1454_v40 = vpop.eup %1453 }
 0x964   :  { %v1092_v44 = vpop.xlane.xlu1 %1091  ;;  %v986_v45 = vmul.f32 %v1454_v40, %v1442_v14 }
 0x965   :  { %1455 = vrcp.f32 %v1092_v44 }
 0x966   :  { %1314 = vmatmul.msk.f32.gmra.mxu1 %vm124_vm2, %v986_v45 }
 0x96b   :  { %v1456_v46 = vpop.eup %1455 }
 0x96c   :  { %v1096_v36 = vmul.f32 %v1456_v46, %v1444_v16 }
 0x96e   :  { %1320 = vmatmul.msk.f32.gmra.mxu0 %vm124_vm2, %v1096_v36 }
 0x97c   :  { %v1154_v0 = vpop.permute.xlu1 %1153 }
 0x9c9   :  { %v1016_v48 = vpop.f32.mrf.mxu1 }
 0x9d8   :  { %v1045_v49 = vpop.f32.mrf.mxu3 }
 0x9d9   :  { %v1046_v51 = vadd.f32 %v1045_v49, %v1016_v48 }
 0x9df   :  { %v1126_v50 = vpop.f32.mrf.mxu0 }
 0x9e0   :  { %v1132_v52 = vadd.f32 %v1126_v50, %v1046_v51  ;;  %v1048_v54 = vpop.f32.mrf.mxu3 }
 0x9e2   :  { %v1134_v55 = vmul.f32 0.33333334, %v1132_v52 }
 0x9e3   :  { %v1019_v53 = vpop.f32.mrf.mxu1 }
 0x9e4   :  { %v1049_v57 = vadd.f32 %v1048_v54, %v1019_v53  ;;  %v1140_v62 = vadd.f32 %v1382_v56, %v1134_v55 }
 0x9e6   :  { %v1142_v1 = vmax.f32 %v1140_v62, 0.0 }
 0x9e8   :  { %v1156_v5 = vmul.f32 %v1149_v4, %v1142_v1 }
 0x9eb   :  { %v1129_v58 = vpop.f32.mrf.mxu0 }
 0x9ec   :  { %v1133_v59 = vadd.f32 %v1129_v58, %v1049_v57 }
 0x9ee   :  { %v1135_v63 = vmul.f32 0.33333334, %v1133_v59 }
 0x9f0   :  { %v1141_v41 = vadd.f32 %v1382_v56, %v1135_v63 }
 0x9f2   :  { %v1143_v2 = vmax.f32 %v1141_v41, 0.0 }
 0x9f4   :  { %v1157_v3 = vmul.f32 %v1154_v0, %v1143_v2 }
 0x9f6   :  { %1176 = vmatpush.msrb.mxu2 %v1157_v3 }
 0x9f8   :  { %1177 = vmatpush.msrb.mxu2 %v1156_v5 }
 0x9f9   :  { %1321 = vmatmul.msk.f32.vlgmr.msrb.gmra.mxu2 %vm124_vm2, %v1158_v6  ;;  %vm1220_vm2 = vcmask 261120  }
 0xa7c   :  { %v1179_v60 = vpop.f32.mrf.mxu2 }
 0xa7d   :  { %1322 = vmatmul.msk.f32.vlgmr.msrb.gmra.mxu1 %vm1187_vm7, %v1179_v60 }
 0xafa   :  { %v1208_v9 = vpop.f32.mrf.mxu1 }
 0xafb   :  { %v1209_v22 = vadd.f32 %v1383_v18, %v1208_v9 }
 0xafd   :  { %v1211_v10 = vmax.f32 %v1209_v22, 0.0 }
 0xaff   :  { %1323 = vmatmul.msk.f32.vlgmr.msra.gmra.mxu3 %vm1220_vm2, %v1211_v10 }
 0xb82   :  { %v1241_v12 = vpop.f32.mrf.mxu3 }
 0xb83   :  { %v1242_v13 = vadd.f32 %v1384_v11, %v1241_v12 }
 0xb85   :  { %v1244_v14 = vmax.f32 %v1242_v13, 0.0 }
 0xb87   :  { %1246 = vst.msk [vmem:[#allocation2] sm:$0x3] %vm1245_vm11, %v1244_v14 }
 0xb88   :  { %1257 = dma.vmem_to_hbm [thread:$0]  %s1253_s2, 32, %s1255_s21, [#allocation3]  }
 0xb89   :  { %1481 = dma.done.wait [#allocation3], 32  }
 0xb8a   :  { %1482 = vsyncadd [#allocation3], 4294967264 }
 0xb8b   :  { %1262 = vsyncpa [#allocation3], 1 }

</bundles_post_ra>
